<compile_context>
chip_gen: v7x
topology: tpu7x:2x2x1
jax: 0.10.0
libtpu: 0.0.40
codegen_flags: <defaults>
</compile_context>

<pallas_src>
import functools
import math

import jax
import jax.numpy as jnp
from jax.experimental import pallas as pl
from jax.experimental.pallas import tpu as pltpu

C_IN = 128     # Conv1d in_channels (== C * F of the 4-D input)
C_MID = 128
C_OUT = 256
KS = 5
STRIDE = 2
GN_EPS = 1e-5
STD_MIN = 1e-6


def _round8(n):
    return ((n + 7) // 8) * 8


def _pick_nb(bs, t_half):
    """Rows per grid step: prefer an even number of grid steps (v7x 2-TC split),
    then minimal batch padding, then larger nb; keep the bf16 x block <= 8 MiB."""
    best_nb, best_key = 1, None
    for cand in range(min(8, bs), 0, -1):
        nblk = -(-bs // cand)
        pad = nblk * cand - bs
        blk_bytes = cand * 2 * t_half * C_IN * 2          # bf16 x block per step
        key = (blk_bytes > (8 << 20), nblk % 2 != 0, pad, -cand)
        if best_key is None or key < best_key:
            best_nb, best_key = cand, key
    return best_nb


def _vmem_limit(nb, t_half, t1, t2):
    x_block = nb * 2 * t_half * C_IN * 2                              # bf16, dbl-buffered
    w_bytes = (3 * KS * C_IN * C_MID + C_MID * C_OUT) * 2 + 12 * C_MID * 4
    scr = (_round8(t1) + _round8(t2) + 8) * C_MID * 4
    io_small = nb * (3 * C_MID + C_MID) * 4
    im2col = _round8(t1) * KS * C_MID * 2                             # widest concat temp
    need = 2 * (x_block + io_small + w_bytes) + scr + 6 * im2col + (2 << 20)
    return int(min(56 << 20, max(32 << 20, need)))                    # headroom < 64 MiB (v7x)


def _timbre_kernel(x_ref, w1_ref, w2_ref, w3_ref, w4_ref, pvec_ref, eps_ref,
                   out_ref, act1_sc, act2_sc, pool_sc, *, nb, t1, t2, t3):
    f32, bf16 = jnp.float32, jnp.bfloat16

    # Loop-invariant per-layer vectors, hoisted out of the row loop.
    b1, g1, be1 = pvec_ref[0:1, :], pvec_ref[1:2, :], pvec_ref[2:3, :]
    b2, g2, be2 = pvec_ref[3:4, :], pvec_ref[4:5, :], pvec_ref[5:6, :]
    b3, g3, be3 = pvec_ref[6:7, :], pvec_ref[7:8, :], pvec_ref[8:9, :]
    b4 = jnp.concatenate([pvec_ref[9:10, :], pvec_ref[10:11, :]], axis=1)   # (1, 256)

    def conv_gn_relu(even, odd, t_out, w_ref, b, g, be):
        # even: (>= t_out+2, 128) bf16, odd: (>= t_out+1, 128) bf16.
        # Stride-2 output row t uses input rows 2t..2t+4 = E[t],O[t],E[t+1],O[t+1],E[t+2],
        # so only the needed output rows hit the MXU (one K=640 matmul).
        taps = [even[0:t_out, :], odd[0:t_out, :],
                even[1:t_out + 1, :], odd[1:t_out + 1, :],
                even[2:t_out + 2, :]]
        im2col = jnp.concatenate(taps, axis=1)                           # (t_out, 640) bf16
        y = jnp.dot(im2col, w_ref[...], preferred_element_type=f32) + b
        # GroupNorm(num_groups=1): per-row stats over (time, channel); centered
        # two-pass variance (numerically safer than E[h^2] - mu^2).
        inv_n = 1.0 / float(t_out * C_MID)
        mu = jnp.sum(y) * inv_n
        d = y - mu
        var = jnp.sum(d * d) * inv_n
        hn = d * jax.lax.rsqrt(var + GN_EPS)
        return jnp.maximum(hn * g + be, 0.0)                             # (t_out, 128) f32

    def row_body(bi, carry):
        # Layer 1: x was deinterleaved in the wrapper -> contiguous bf16 reads only.
        e1 = x_ref[bi, 0, pl.ds(0, t1 + 2), :]
        o1 = x_ref[bi, 1, pl.ds(0, t1 + 1), :]
        h1 = conv_gn_relu(e1, o1, t1, w1_ref, b1, g1, be1)
        act1_sc[pl.ds(0, t1), :] = h1

        # Layers 2/3: two strided (even/odd) copies of the f32 activation scratch,
        # cast to bf16 before the im2col concat.
        e2 = act1_sc[pl.ds(0, t2 + 2, STRIDE), :].astype(bf16)
        o2 = act1_sc[pl.ds(1, t2 + 1, STRIDE), :].astype(bf16)
        h2 = conv_gn_relu(e2, o2, t2, w2_ref, b2, g2, be2)
        act2_sc[pl.ds(0, t2), :] = h2

        e3 = act2_sc[pl.ds(0, t3 + 2, STRIDE), :].astype(bf16)
        o3 = act2_sc[pl.ds(1, t3 + 1, STRIDE), :].astype(bf16)
        h3 = conv_gn_relu(e3, o3, t3, w3_ref, b3, g3, be3)

        # AdaptiveAvgPool1d(1).  conv4 (k=1) is linear, so it is applied once on
        # the stacked pooled rows after the loop (single M=nb matmul).
        pool_sc[pl.ds(bi, 1), :] = jnp.mean(h3, axis=0, keepdims=True)
        return carry

    if nb == 1:
        row_body(0, 0)
    else:
        jax.lax.fori_loop(0, nb, row_body, 0)

    # conv4 + reparameterized sample, vectorized over the nb rows of this block.
    pooled = pool_sc[pl.ds(0, nb), :].astype(bf16)                       # (nb, 128)
    h4 = jnp.dot(pooled, w4_ref[...], preferred_element_type=f32) + b4   # (nb, 256)
    mean_v = h4[:, :C_MID]
    logvar = h4[:, C_MID:]
    std_v = jnp.maximum(jnp.exp(0.5 * logvar), STD_MIN)
    lat_v = mean_v + std_v * eps_ref[:, 0, :]
    # Single lane-dense store per grid step: [mean | std | latent] on the lane axis.
    out_ref[:, 0, :] = jnp.concatenate([mean_v, std_v, lat_v], axis=1)   # (nb, 384)


def timbre_encoder_forward(x, params, eps, *, nb=None):
    """x: (BS, C, T, F) with C*F == 128 (as in the PyTorch module)."""
    BS, C, T, F_ = x.shape
    assert C * F_ == C_IN, "Conv1d expects C * F == 128"

    t1 = (T - KS) // STRIDE + 1
    t2 = (t1 - KS) // STRIDE + 1
    t3 = (t2 - KS) // STRIDE + 1
    assert t3 >= 1, "input too short for three stride-2 k=5 convs"

    t_half = (T + 1) // 2
    t_pad = 2 * t_half

    if nb is None:
        nb = _pick_nb(BS, t_half)
    bs_pad = pl.cdiv(BS, nb) * nb
    num_blocks = bs_pad // nb

    # PyTorch: x.permute(0,1,3,2).reshape(BS, C*F, T), conv over T.  Produce
    # (BS, T, C*F) with channel index c*F + f, pad batch/time, then deinterleave
    # time into even/odd planes in the wrapper so layer 1 uses only contiguous
    # reads.  bf16: x is only consumed by bf16 MXU matmuls.
    x_tc = jnp.transpose(x, (0, 2, 1, 3)).reshape(BS, T, C_IN)
    x_tc = jnp.pad(x_tc, ((0, bs_pad - BS), (0, t_pad - T), (0, 0)))
    x_eo = jnp.transpose(x_tc.reshape(bs_pad, t_half, 2, C_IN),
                         (0, 2, 1, 3)).astype(jnp.bfloat16)          # (bs, 2, t_half, 128)

    eps3 = eps.reshape(BS, 1, C_MID).astype(jnp.float32)
    eps3 = jnp.pad(eps3, ((0, bs_pad - BS), (0, 0), (0, 0)))

    # Conv weights reshaped for the im2col matmul ((k,cin,cout) -> (k*cin,cout)), bf16.
    w1 = params["w1"].reshape(KS * C_IN, C_MID).astype(jnp.bfloat16)
    w2 = params["w2"].reshape(KS * C_MID, C_MID).astype(jnp.bfloat16)
    w3 = params["w3"].reshape(KS * C_MID, C_MID).astype(jnp.bfloat16)
    w4 = params["w4"].astype(jnp.bfloat16)

    # Pack the 13 small per-layer vectors into one (12, 128) parameter array.
    pvec = jnp.concatenate(
        [params["b1"], params["g1"], params["be1"],
         params["b2"], params["g2"], params["be2"],
         params["b3"], params["g3"], params["be3"],
         params["b4"][:, :C_MID], params["b4"][:, C_MID:],
         jnp.zeros((1, C_MID), jnp.float32)], axis=0).astype(jnp.float32)

    kernel = functools.partial(_timbre_kernel, nb=nb, t1=t1, t2=t2, t3=t3)

    def rep(shape):
        return pl.BlockSpec(shape, lambda i, _n=len(shape): (0,) * _n)

    in_specs = [
        pl.BlockSpec((nb, 2, t_half, C_IN), lambda i: (i, 0, 0, 0)),   # x (even/odd planes)
        rep((KS * C_IN, C_MID)),                                       # w1
        rep((KS * C_MID, C_MID)),                                      # w2
        rep((KS * C_MID, C_MID)),                                      # w3
        rep((C_MID, C_OUT)),                                           # w4 (k=1)
        rep((12, C_MID)),                                              # packed b/g/be/b4
        pl.BlockSpec((nb, 1, C_MID), lambda i: (i, 0, 0)),             # eps noise
    ]
    out_specs = pl.BlockSpec((nb, 1, 3 * C_MID), lambda i: (i, 0, 0))
    out_shape = jax.ShapeDtypeStruct((bs_pad, 1, 3 * C_MID), jnp.float32)

    out = pl.pallas_call(
        kernel,
        out_shape=out_shape,
        grid=(num_blocks,),
        in_specs=in_specs,
        out_specs=out_specs,
        scratch_shapes=[
            pltpu.VMEM((_round8(t1), C_MID), jnp.float32),   # h1 activation (per row)
            pltpu.VMEM((_round8(t2), C_MID), jnp.float32),   # h2 activation (per row)
            pltpu.VMEM((max(8, _round8(nb)), C_MID), jnp.float32),   # stacked pooled rows
        ],
        compiler_params=pltpu.CompilerParams(
            dimension_semantics=("parallel",),
            vmem_limit_bytes=_vmem_limit(nb, t_half, t1, t2)),
    )(x_eo, w1, w2, w3, w4, pvec, eps3)

    flat = out[:BS, 0]
    r4 = lambda a: a.reshape(BS, 8, 1, 16)
    mean = flat[:, :C_MID]
    std = flat[:, C_MID:2 * C_MID]
    lat = flat[:, 2 * C_MID:]
    # PyTorch returns (timbre_latent, mean, std), each (BS, 8, 1, 16).
    return r4(lat), r4(mean), r4(std)


def init_params(key):
    """Deterministic synthetic parameters. Conv weights stored as (k, cin, cout)."""
    keys = jax.random.split(key, 14)

    def conv_w(k, ks, cin, cout):
        return jax.random.normal(k, (ks, cin, cout), jnp.float32) / math.sqrt(ks * cin)

    def vec(k, n, scale=0.05):
        return scale * jax.random.normal(k, (1, n), jnp.float32)

    p = {}
    p["w1"] = conv_w(keys[0], KS, C_IN, C_MID)
    p["b1"] = vec(keys[1], C_MID)
    p["g1"] = 1.0 + vec(keys[2], C_MID)
    p["be1"] = vec(keys[3], C_MID)
    p["w2"] = conv_w(keys[4], KS, C_MID, C_MID)
    p["b2"] = vec(keys[5], C_MID)
    p["g2"] = 1.0 + vec(keys[6], C_MID)
    p["be2"] = vec(keys[7], C_MID)
    p["w3"] = conv_w(keys[8], KS, C_MID, C_MID)
    p["b3"] = vec(keys[9], C_MID)
    p["g3"] = 1.0 + vec(keys[10], C_MID)
    p["be3"] = vec(keys[11], C_MID)
    p["w4"] = conv_w(keys[12], 1, C_MID, C_OUT)[0]               # (128, 256)
    p["b4"] = vec(keys[13], C_OUT)
    return p


def reference_forward(x, p, eps):
    """Pure-JAX f32 reference with the PyTorch module's semantics (validation)."""
    BS, C, T, F_ = x.shape
    h = jnp.transpose(x, (0, 1, 3, 2)).reshape(BS, C * F_, T)
    h = jnp.transpose(h, (0, 2, 1)).astype(jnp.float32)          # (BS, T, 128)

    def conv(h, w, b, stride):
        ks = w.shape[0]
        t_out = (h.shape[1] - ks) // stride + 1
        acc = jnp.zeros((h.shape[0], t_out, w.shape[2]), jnp.float32)
        for k in range(ks):
            sl = h[:, k:k + stride * (t_out - 1) + 1:stride, :]
            acc = acc + jnp.einsum("btc,cd->btd", sl, w[k])
        return acc + b

    def gn_relu(h, g, be):
        mu = jnp.mean(h, axis=(1, 2), keepdims=True)
        var = jnp.mean((h - mu) ** 2, axis=(1, 2), keepdims=True)
        y = (h - mu) * jax.lax.rsqrt(var + GN_EPS) * g + be
        return jnp.maximum(y, 0.0)

    h = gn_relu(conv(h, p["w1"], p["b1"], STRIDE), p["g1"], p["be1"])
    h = gn_relu(conv(h, p["w2"], p["b2"], STRIDE), p["g2"], p["be2"])
    h = gn_relu(conv(h, p["w3"], p["b3"], STRIDE), p["g3"], p["be3"])
    h = jnp.einsum("btc,cd->btd", h, p["w4"]) + p["b4"]
    pooled = jnp.mean(h, axis=1)                                 # (BS, 256)
    mean = pooled[:, :C_MID]
    logvar = pooled[:, C_MID:]
    std = jnp.maximum(jnp.exp(0.5 * logvar), STD_MIN)
    lat = mean + std * eps.reshape(BS, C_MID)
    r4 = lambda a: a.reshape(BS, 8, 1, 16)
    return r4(lat), r4(mean), r4(std)


if __name__ == "__main__":
    key = jax.random.PRNGKey(0)
    k_x1, k_e1, k_x2, k_e2, k_p = jax.random.split(key, 5)
    params = init_params(k_p)

    def check(bs, c, t, f, kx, ke):
        x = jax.random.normal(kx, (bs, c, t, f), jnp.float32)
        # TODO(synk): torch.distributions.Normal.rsample draws its own RNG; here the
        # reparameterization noise is supplied as an explicit deterministic input.
        eps = jax.random.normal(ke, (bs, 8, 1, 16), jnp.float32)
        outs = timbre_encoder_forward(x, params, eps)
        jax.block_until_ready(outs)
        refs = reference_forward(x, params, eps)
        # Kernel matmuls use bf16 operands (f32 accumulation); reference is pure f32.
        for a, b in zip(outs, refs):
            assert a.shape == (bs, 8, 1, 16) and b.shape == (bs, 8, 1, 16)
            err = float(jnp.max(jnp.abs(a - b)))
            assert jnp.allclose(a, b, rtol=3e-2, atol=3e-2), f"max abs err {err}"

    check(2, 8, 64, 16, k_x1, k_e1)    # nb=1, 2 grid steps (even -> both v7x TCs busy)
    check(5, 8, 45, 16, k_x2, k_e2)    # nb=3, batch + odd-T padding, fori_loop path
    print("KERNEL_OK")
</pallas_src>

<mosaic_0001>
module attributes {stable_mosaic.version = 11 : i64} {
  func.func @_timbre_kernel(%arg0: i32, %arg1: memref<1x2x32x128xbf16, #tpu.memory_space<vmem>>, %arg2: memref<640x128xbf16, #tpu.memory_space<vmem>>, %arg3: memref<640x128xbf16, #tpu.memory_space<vmem>>, %arg4: memref<640x128xbf16, #tpu.memory_space<vmem>>, %arg5: memref<128x256xbf16, #tpu.memory_space<vmem>>, %arg6: memref<12x128xf32, #tpu.memory_space<vmem>>, %arg7: memref<1x1x128xf32, #tpu.memory_space<vmem>>, %arg8: memref<1x1x384xf32, #tpu.memory_space<vmem>>, %arg9: memref<32x128xf32, #tpu.memory_space<vmem>>, %arg10: memref<16x128xf32, #tpu.memory_space<vmem>>, %arg11: memref<8x128xf32, #tpu.memory_space<vmem>>) attributes {dimension_semantics = [#tpu.dimension_semantics<parallel>], iteration_bounds = array<i64: 2>, scalar_prefetch = 0 : i64, scratch_operands = 3 : i64, tpu.core_type = #tpu.core_type<tc>, window_params = [{transform_indices = @transform_0, window_bounds = array<i64: 1, 2, 32, 128>}, {pipeline_mode = #tpu.pipeline_mode<synchronous>, transform_indices = @transform_1, window_bounds = array<i64: 640, 128>}, {pipeline_mode = #tpu.pipeline_mode<synchronous>, transform_indices = @transform_2, window_bounds = array<i64: 640, 128>}, {pipeline_mode = #tpu.pipeline_mode<synchronous>, transform_indices = @transform_3, window_bounds = array<i64: 640, 128>}, {pipeline_mode = #tpu.pipeline_mode<synchronous>, transform_indices = @transform_4, window_bounds = array<i64: 128, 256>}, {pipeline_mode = #tpu.pipeline_mode<synchronous>, transform_indices = @transform_5, window_bounds = array<i64: 12, 128>}, {transform_indices = @transform_6, window_bounds = array<i64: 1, 1, 128>}, {transform_indices = @transform_7, window_bounds = array<i64: 1, 1, 384>}]} {
    %c0 = arith.constant 0 : index
    %c0_0 = arith.constant 0 : index
    %0 = vector.load %arg6[%c0, %c0_0] : memref<12x128xf32, #tpu.memory_space<vmem>>, vector<1x128xf32>
    %c1 = arith.constant 1 : index
    %c0_1 = arith.constant 0 : index
    %1 = vector.load %arg6[%c1, %c0_1] : memref<12x128xf32, #tpu.memory_space<vmem>>, vector<1x128xf32>
    %c2 = arith.constant 2 : index
    %c0_2 = arith.constant 0 : index
    %2 = vector.load %arg6[%c2, %c0_2] : memref<12x128xf32, #tpu.memory_space<vmem>>, vector<1x128xf32>
    %c3 = arith.constant 3 : index
    %c0_3 = arith.constant 0 : index
    %3 = vector.load %arg6[%c3, %c0_3] : memref<12x128xf32, #tpu.memory_space<vmem>>, vector<1x128xf32>
    %c4 = arith.constant 4 : index
    %c0_4 = arith.constant 0 : index
    %4 = vector.load %arg6[%c4, %c0_4] : memref<12x128xf32, #tpu.memory_space<vmem>>, vector<1x128xf32>
    %c5 = arith.constant 5 : index
    %c0_5 = arith.constant 0 : index
    %5 = vector.load %arg6[%c5, %c0_5] : memref<12x128xf32, #tpu.memory_space<vmem>>, vector<1x128xf32>
    %c6 = arith.constant 6 : index
    %c0_6 = arith.constant 0 : index
    %6 = vector.load %arg6[%c6, %c0_6] : memref<12x128xf32, #tpu.memory_space<vmem>>, vector<1x128xf32>
    %c7 = arith.constant 7 : index
    %c0_7 = arith.constant 0 : index
    %7 = vector.load %arg6[%c7, %c0_7] : memref<12x128xf32, #tpu.memory_space<vmem>>, vector<1x128xf32>
    %c8 = arith.constant 8 : index
    %c0_8 = arith.constant 0 : index
    %8 = vector.load %arg6[%c8, %c0_8] : memref<12x128xf32, #tpu.memory_space<vmem>>, vector<1x128xf32>
    %c9 = arith.constant 9 : index
    %c0_9 = arith.constant 0 : index
    %9 = vector.load %arg6[%c9, %c0_9] : memref<12x128xf32, #tpu.memory_space<vmem>>, vector<1x128xf32>
    %c10 = arith.constant 10 : index
    %c0_10 = arith.constant 0 : index
    %10 = vector.load %arg6[%c10, %c0_10] : memref<12x128xf32, #tpu.memory_space<vmem>>, vector<1x128xf32>
    %11 = tpu.concatenate %9, %10 in 1 : vector<1x128xf32>, vector<1x128xf32> -> vector<1x256xf32>
    %c0_11 = arith.constant 0 : index
    %c0_12 = arith.constant 0 : index
    %c0_13 = arith.constant 0 : index
    %c0_14 = arith.constant 0 : index
    %12 = vector.load %arg1[%c0_11, %c0_12, %c0_13, %c0_14] : memref<1x2x32x128xbf16, #tpu.memory_space<vmem>>, vector<1x1x32x128xbf16>
    %13 = vector.shape_cast %12 : vector<1x1x32x128xbf16> to vector<32x128xbf16>
    %c0_15 = arith.constant 0 : index
    %c1_16 = arith.constant 1 : index
    %c0_17 = arith.constant 0 : index
    %c0_18 = arith.constant 0 : index
    %14 = vector.load %arg1[%c0_15, %c1_16, %c0_17, %c0_18] : memref<1x2x32x128xbf16, #tpu.memory_space<vmem>>, vector<1x1x31x128xbf16>
    %15 = vector.shape_cast %14 : vector<1x1x31x128xbf16> to vector<31x128xbf16>
    %16 = vector.extract_strided_slice %13 {offsets = [0, 0], sizes = [30, 128], strides = [1, 1]} : vector<32x128xbf16> to vector<30x128xbf16>
    %17 = vector.extract_strided_slice %15 {offsets = [0, 0], sizes = [30, 128], strides = [1, 1]} : vector<31x128xbf16> to vector<30x128xbf16>
    %18 = vector.extract_strided_slice %13 {offsets = [1, 0], sizes = [30, 128], strides = [1, 1]} : vector<32x128xbf16> to vector<30x128xbf16>
    %19 = vector.extract_strided_slice %15 {offsets = [1, 0], sizes = [30, 128], strides = [1, 1]} : vector<31x128xbf16> to vector<30x128xbf16>
    %20 = vector.extract_strided_slice %13 {offsets = [2, 0], sizes = [30, 128], strides = [1, 1]} : vector<32x128xbf16> to vector<30x128xbf16>
    %21 = tpu.concatenate %16, %17, %18, %19, %20 in 1 : vector<30x128xbf16>, vector<30x128xbf16>, vector<30x128xbf16>, vector<30x128xbf16>, vector<30x128xbf16> -> vector<30x640xbf16>
    %c0_19 = arith.constant 0 : index
    %c0_20 = arith.constant 0 : index
    %22 = vector.load %arg2[%c0_19, %c0_20] : memref<640x128xbf16, #tpu.memory_space<vmem>>, vector<640x128xbf16>
    %cst = arith.constant dense<0.000000e+00> : vector<30x128xf32>
    %23 = tpu.matmul %21, %22, %cst {dimension_numbers = #tpu.dot_dimension_numbers<[1], [0], [0], [1], [0, 0, 1, 1], [], []>} : vector<30x640xbf16>, vector<640x128xbf16>, vector<30x128xf32> -> vector<30x128xf32>
    %24 = vector.broadcast %0 : vector<1x128xf32> to vector<30x128xf32>
    %25 = arith.addf %23, %24 : vector<30x128xf32>
    %26 = vector.shape_cast %25 : vector<30x128xf32> to vector<1x30x128xf32>
    %cst_21 = arith.constant dense<0.000000e+00> : vector<1xf32>
    %27 = vector.multi_reduction <add>, %26, %cst_21 [1, 2] : vector<1x30x128xf32> to vector<1xf32>
    %28 = vector.shape_cast %27 : vector<1xf32> to vector<1x1x1xf32>
    %29 = vector.extract %28[0, 0, 0] : f32 from vector<1x1x1xf32>
    %cst_22 = arith.constant 2.6041668E-4 : f32
    %30 = arith.mulf %29, %cst_22 : f32
    %31 = vector.broadcast %30 : f32 to vector<30x128xf32>
    %32 = arith.subf %25, %31 : vector<30x128xf32>
    %33 = arith.mulf %32, %32 : vector<30x128xf32>
    %34 = vector.shape_cast %33 : vector<30x128xf32> to vector<1x30x128xf32>
    %cst_23 = arith.constant dense<0.000000e+00> : vector<1xf32>
    %35 = vector.multi_reduction <add>, %34, %cst_23 [1, 2] : vector<1x30x128xf32> to vector<1xf32>
    %36 = vector.shape_cast %35 : vector<1xf32> to vector<1x1x1xf32>
    %37 = vector.extract %36[0, 0, 0] : f32 from vector<1x1x1xf32>
    %cst_24 = arith.constant 2.6041668E-4 : f32
    %38 = arith.mulf %37, %cst_24 : f32
    %cst_25 = arith.constant 9.99999974E-6 : f32
    %39 = arith.addf %38, %cst_25 : f32
    %40 = math.rsqrt %39 : f32
    %41 = vector.broadcast %40 : f32 to vector<30x128xf32>
    %42 = arith.mulf %32, %41 : vector<30x128xf32>
    %43 = vector.broadcast %1 : vector<1x128xf32> to vector<30x128xf32>
    %44 = arith.mulf %42, %43 : vector<30x128xf32>
    %45 = vector.broadcast %2 : vector<1x128xf32> to vector<30x128xf32>
    %46 = arith.addf %44, %45 : vector<30x128xf32>
    %cst_26 = arith.constant 0.000000e+00 : f32
    %47 = vector.broadcast %cst_26 : f32 to vector<30x128xf32>
    %48 = arith.maximumf %46, %47 : vector<30x128xf32>
    %c0_27 = arith.constant 0 : index
    %c0_28 = arith.constant 0 : index
    %49 = vector.load %arg9[%c0_27, %c0_28] : memref<32x128xf32, #tpu.memory_space<vmem>>, vector<30x128xf32>
    tpu.vector_store %arg9[%c0_27, %c0_28], %48 {strides = array<i32>} : memref<32x128xf32, #tpu.memory_space<vmem>>, vector<30x128xf32>,
    %c0_29 = arith.constant 0 : index
    %c0_30 = arith.constant 0 : index
    %50 = tpu.strided_load %arg9[%c0_29, %c0_30] {strides = array<i32: 2, 1>} : memref<32x128xf32, #tpu.memory_space<vmem>>, vector<15x128xf32>
    %51 = arith.truncf %50 : vector<15x128xf32> to vector<15x128xbf16>
    %c1_31 = arith.constant 1 : index
    %c0_32 = arith.constant 0 : index
    %52 = tpu.strided_load %arg9[%c1_31, %c0_32] {strides = array<i32: 2, 1>} : memref<32x128xf32, #tpu.memory_space<vmem>>, vector<14x128xf32>
    %53 = arith.truncf %52 : vector<14x128xf32> to vector<14x128xbf16>
    %54 = vector.extract_strided_slice %51 {offsets = [0, 0], sizes = [13, 128], strides = [1, 1]} : vector<15x128xbf16> to vector<13x128xbf16>
    %55 = vector.extract_strided_slice %53 {offsets = [0, 0], sizes = [13, 128], strides = [1, 1]} : vector<14x128xbf16> to vector<13x128xbf16>
    %56 = vector.extract_strided_slice %51 {offsets = [1, 0], sizes = [13, 128], strides = [1, 1]} : vector<15x128xbf16> to vector<13x128xbf16>
    %57 = vector.extract_strided_slice %53 {offsets = [1, 0], sizes = [13, 128], strides = [1, 1]} : vector<14x128xbf16> to vector<13x128xbf16>
    %58 = vector.extract_strided_slice %51 {offsets = [2, 0], sizes = [13, 128], strides = [1, 1]} : vector<15x128xbf16> to vector<13x128xbf16>
    %59 = tpu.concatenate %54, %55, %56, %57, %58 in 1 : vector<13x128xbf16>, vector<13x128xbf16>, vector<13x128xbf16>, vector<13x128xbf16>, vector<13x128xbf16> -> vector<13x640xbf16>
    %c0_33 = arith.constant 0 : index
    %c0_34 = arith.constant 0 : index
    %60 = vector.load %arg3[%c0_33, %c0_34] : memref<640x128xbf16, #tpu.memory_space<vmem>>, vector<640x128xbf16>
    %cst_35 = arith.constant dense<0.000000e+00> : vector<13x128xf32>
    %61 = tpu.matmul %59, %60, %cst_35 {dimension_numbers = #tpu.dot_dimension_numbers<[1], [0], [0], [1], [0, 0, 1, 1], [], []>} : vector<13x640xbf16>, vector<640x128xbf16>, vector<13x128xf32> -> vector<13x128xf32>
    %62 = vector.broadcast %3 : vector<1x128xf32> to vector<13x128xf32>
    %63 = arith.addf %61, %62 : vector<13x128xf32>
    %64 = vector.shape_cast %63 : vector<13x128xf32> to vector<1x13x128xf32>
    %cst_36 = arith.constant dense<0.000000e+00> : vector<1xf32>
    %65 = vector.multi_reduction <add>, %64, %cst_36 [1, 2] : vector<1x13x128xf32> to vector<1xf32>
    %66 = vector.shape_cast %65 : vector<1xf32> to vector<1x1x1xf32>
    %67 = vector.extract %66[0, 0, 0] : f32 from vector<1x1x1xf32>
    %cst_37 = arith.constant 6.00961561E-4 : f32
    %68 = arith.mulf %67, %cst_37 : f32
    %69 = vector.broadcast %68 : f32 to vector<13x128xf32>
    %70 = arith.subf %63, %69 : vector<13x128xf32>
    %71 = arith.mulf %70, %70 : vector<13x128xf32>
    %72 = vector.shape_cast %71 : vector<13x128xf32> to vector<1x13x128xf32>
    %cst_38 = arith.constant dense<0.000000e+00> : vector<1xf32>
    %73 = vector.multi_reduction <add>, %72, %cst_38 [1, 2] : vector<1x13x128xf32> to vector<1xf32>
    %74 = vector.shape_cast %73 : vector<1xf32> to vector<1x1x1xf32>
    %75 = vector.extract %74[0, 0, 0] : f32 from vector<1x1x1xf32>
    %cst_39 = arith.constant 6.00961561E-4 : f32
    %76 = arith.mulf %75, %cst_39 : f32
    %cst_40 = arith.constant 9.99999974E-6 : f32
    %77 = arith.addf %76, %cst_40 : f32
    %78 = math.rsqrt %77 : f32
    %79 = vector.broadcast %78 : f32 to vector<13x128xf32>
    %80 = arith.mulf %70, %79 : vector<13x128xf32>
    %81 = vector.broadcast %4 : vector<1x128xf32> to vector<13x128xf32>
    %82 = arith.mulf %80, %81 : vector<13x128xf32>
    %83 = vector.broadcast %5 : vector<1x128xf32> to vector<13x128xf32>
    %84 = arith.addf %82, %83 : vector<13x128xf32>
    %cst_41 = arith.constant 0.000000e+00 : f32
    %85 = vector.broadcast %cst_41 : f32 to vector<13x128xf32>
    %86 = arith.maximumf %84, %85 : vector<13x128xf32>
    %c0_42 = arith.constant 0 : index
    %c0_43 = arith.constant 0 : index
    %87 = vector.load %arg10[%c0_42, %c0_43] : memref<16x128xf32, #tpu.memory_space<vmem>>, vector<13x128xf32>
    tpu.vector_store %arg10[%c0_42, %c0_43], %86 {strides = array<i32>} : memref<16x128xf32, #tpu.memory_space<vmem>>, vector<13x128xf32>,
    %c0_44 = arith.constant 0 : index
    %c0_45 = arith.constant 0 : index
    %88 = tpu.strided_load %arg10[%c0_44, %c0_45] {strides = array<i32: 2, 1>} : memref<16x128xf32, #tpu.memory_space<vmem>>, vector<7x128xf32>
    %89 = arith.truncf %88 : vector<7x128xf32> to vector<7x128xbf16>
    %c1_46 = arith.constant 1 : index
    %c0_47 = arith.constant 0 : index
    %90 = tpu.strided_load %arg10[%c1_46, %c0_47] {strides = array<i32: 2, 1>} : memref<16x128xf32, #tpu.memory_space<vmem>>, vector<6x128xf32>
    %91 = arith.truncf %90 : vector<6x128xf32> to vector<6x128xbf16>
    %92 = vector.extract_strided_slice %89 {offsets = [0, 0], sizes = [5, 128], strides = [1, 1]} : vector<7x128xbf16> to vector<5x128xbf16>
    %93 = vector.extract_strided_slice %91 {offsets = [0, 0], sizes = [5, 128], strides = [1, 1]} : vector<6x128xbf16> to vector<5x128xbf16>
    %94 = vector.extract_strided_slice %89 {offsets = [1, 0], sizes = [5, 128], strides = [1, 1]} : vector<7x128xbf16> to vector<5x128xbf16>
    %95 = vector.extract_strided_slice %91 {offsets = [1, 0], sizes = [5, 128], strides = [1, 1]} : vector<6x128xbf16> to vector<5x128xbf16>
    %96 = vector.extract_strided_slice %89 {offsets = [2, 0], sizes = [5, 128], strides = [1, 1]} : vector<7x128xbf16> to vector<5x128xbf16>
    %97 = tpu.concatenate %92, %93, %94, %95, %96 in 1 : vector<5x128xbf16>, vector<5x128xbf16>, vector<5x128xbf16>, vector<5x128xbf16>, vector<5x128xbf16> -> vector<5x640xbf16>
    %c0_48 = arith.constant 0 : index
    %c0_49 = arith.constant 0 : index
    %98 = vector.load %arg4[%c0_48, %c0_49] : memref<640x128xbf16, #tpu.memory_space<vmem>>, vector<640x128xbf16>
    %cst_50 = arith.constant dense<0.000000e+00> : vector<5x128xf32>
    %99 = tpu.matmul %97, %98, %cst_50 {dimension_numbers = #tpu.dot_dimension_numbers<[1], [0], [0], [1], [0, 0, 1, 1], [], []>} : vector<5x640xbf16>, vector<640x128xbf16>, vector<5x128xf32> -> vector<5x128xf32>
    %100 = vector.broadcast %6 : vector<1x128xf32> to vector<5x128xf32>
    %101 = arith.addf %99, %100 : vector<5x128xf32>
    %102 = vector.shape_cast %101 : vector<5x128xf32> to vector<1x5x128xf32>
    %cst_51 = arith.constant dense<0.000000e+00> : vector<1xf32>
    %103 = vector.multi_reduction <add>, %102, %cst_51 [1, 2] : vector<1x5x128xf32> to vector<1xf32>
    %104 = vector.shape_cast %103 : vector<1xf32> to vector<1x1x1xf32>
    %105 = vector.extract %104[0, 0, 0] : f32 from vector<1x1x1xf32>
    %cst_52 = arith.constant 1.562500e-03 : f32
    %106 = arith.mulf %105, %cst_52 : f32
    %107 = vector.broadcast %106 : f32 to vector<5x128xf32>
    %108 = arith.subf %101, %107 : vector<5x128xf32>
    %109 = arith.mulf %108, %108 : vector<5x128xf32>
    %110 = vector.shape_cast %109 : vector<5x128xf32> to vector<1x5x128xf32>
    %cst_53 = arith.constant dense<0.000000e+00> : vector<1xf32>
    %111 = vector.multi_reduction <add>, %110, %cst_53 [1, 2] : vector<1x5x128xf32> to vector<1xf32>
    %112 = vector.shape_cast %111 : vector<1xf32> to vector<1x1x1xf32>
    %113 = vector.extract %112[0, 0, 0] : f32 from vector<1x1x1xf32>
    %cst_54 = arith.constant 1.562500e-03 : f32
    %114 = arith.mulf %113, %cst_54 : f32
    %cst_55 = arith.constant 9.99999974E-6 : f32
    %115 = arith.addf %114, %cst_55 : f32
    %116 = math.rsqrt %115 : f32
    %117 = vector.broadcast %116 : f32 to vector<5x128xf32>
    %118 = arith.mulf %108, %117 : vector<5x128xf32>
    %119 = vector.broadcast %7 : vector<1x128xf32> to vector<5x128xf32>
    %120 = arith.mulf %118, %119 : vector<5x128xf32>
    %121 = vector.broadcast %8 : vector<1x128xf32> to vector<5x128xf32>
    %122 = arith.addf %120, %121 : vector<5x128xf32>
    %cst_56 = arith.constant 0.000000e+00 : f32
    %123 = vector.broadcast %cst_56 : f32 to vector<5x128xf32>
    %124 = arith.maximumf %122, %123 : vector<5x128xf32>
    %cst_57 = arith.constant dense<0.000000e+00> : vector<128xf32>
    %125 = vector.multi_reduction <add>, %124, %cst_57 [0] : vector<5x128xf32> to vector<128xf32>
    %126 = vector.shape_cast %125 : vector<128xf32> to vector<1x128xf32>
    %cst_58 = arith.constant 5.000000e+00 : f32
    %127 = vector.broadcast %cst_58 : f32 to vector<1x128xf32>
    %128 = arith.divf %126, %127 : vector<1x128xf32>
    %c0_59 = arith.constant 0 : index
    %c0_60 = arith.constant 0 : index
    %129 = vector.load %arg11[%c0_59, %c0_60] : memref<8x128xf32, #tpu.memory_space<vmem>>, vector<1x128xf32>
    tpu.vector_store %arg11[%c0_59, %c0_60], %128 {strides = array<i32>} : memref<8x128xf32, #tpu.memory_space<vmem>>, vector<1x128xf32>,
    %c0_61 = arith.constant 0 : index
    %c0_62 = arith.constant 0 : index
    %130 = vector.load %arg11[%c0_61, %c0_62] : memref<8x128xf32, #tpu.memory_space<vmem>>, vector<1x128xf32>
    %131 = arith.truncf %130 : vector<1x128xf32> to vector<1x128xbf16>
    %c0_63 = arith.constant 0 : index
    %c0_64 = arith.constant 0 : index
    %132 = vector.load %arg5[%c0_63, %c0_64] : memref<128x256xbf16, #tpu.memory_space<vmem>>, vector<128x256xbf16>
    %cst_65 = arith.constant dense<0.000000e+00> : vector<1x256xf32>
    %133 = tpu.matmul %131, %132, %cst_65 {dimension_numbers = #tpu.dot_dimension_numbers<[1], [0], [0], [1], [0, 0, 1, 1], [], []>} : vector<1x128xbf16>, vector<128x256xbf16>, vector<1x256xf32> -> vector<1x256xf32>
    %134 = arith.addf %133, %11 : vector<1x256xf32>
    %135 = vector.extract_strided_slice %134 {offsets = [0, 0], sizes = [1, 128], strides = [1, 1]} : vector<1x256xf32> to vector<1x128xf32>
    %136 = vector.extract_strided_slice %134 {offsets = [0, 128], sizes = [1, 128], strides = [1, 1]} : vector<1x256xf32> to vector<1x128xf32>
    %cst_66 = arith.constant 5.000000e-01 : f32
    %137 = vector.broadcast %cst_66 : f32 to vector<1x128xf32>
    %138 = arith.mulf %137, %136 : vector<1x128xf32>
    %139 = math.exp %138 : vector<1x128xf32>
    %cst_67 = arith.constant 9.99999997E-7 : f32
    %140 = vector.broadcast %cst_67 : f32 to vector<1x128xf32>
    %141 = arith.maximumf %139, %140 : vector<1x128xf32>
    %c0_68 = arith.constant 0 : index
    %c0_69 = arith.constant 0 : index
    %c0_70 = arith.constant 0 : index
    %142 = vector.load %arg7[%c0_68, %c0_69, %c0_70] : memref<1x1x128xf32, #tpu.memory_space<vmem>>, vector<1x1x128xf32>
    %143 = vector.shape_cast %142 : vector<1x1x128xf32> to vector<1x128xf32>
    %144 = arith.mulf %141, %143 : vector<1x128xf32>
    %145 = arith.addf %135, %144 : vector<1x128xf32>
    %146 = tpu.concatenate %135, %141, %145 in 1 : vector<1x128xf32>, vector<1x128xf32>, vector<1x128xf32> -> vector<1x384xf32>
    %c0_71 = arith.constant 0 : index
    %c0_72 = arith.constant 0 : index
    %c0_73 = arith.constant 0 : index
    %147 = vector.load %arg8[%c0_71, %c0_72, %c0_73] : memref<1x1x384xf32, #tpu.memory_space<vmem>>, vector<1x1x384xf32>
    %148 = vector.shape_cast %147 : vector<1x1x384xf32> to vector<1x384xf32>
    %149 = vector.shape_cast %146 : vector<1x384xf32> to vector<1x1x384xf32>
    tpu.vector_store %arg8[%c0_71, %c0_72, %c0_73], %149 {strides = array<i32>} : memref<1x1x384xf32, #tpu.memory_space<vmem>>, vector<1x1x384xf32>,
    return
  }
  func.func @transform_0(%arg0: i32) -> (i32, i32, i32, i32) {
    %c0_i32 = arith.constant 0 : i32
    %c0_i32_0 = arith.constant 0 : i32
    %c0_i32_1 = arith.constant 0 : i32
    %c0_i32_2 = arith.constant 0 : i32
    return %arg0, %c0_i32, %c0_i32_0, %c0_i32_1 : i32, i32, i32, i32
  }
  func.func @transform_1(%arg0: i32) -> (i32, i32) {
    %c0_i32 = arith.constant 0 : i32
    %c0_i32_0 = arith.constant 0 : i32
    %c0_i32_1 = arith.constant 0 : i32
    return %c0_i32, %c0_i32_0 : i32, i32
  }
  func.func @transform_2(%arg0: i32) -> (i32, i32) {
    %c0_i32 = arith.constant 0 : i32
    %c0_i32_0 = arith.constant 0 : i32
    %c0_i32_1 = arith.constant 0 : i32
    return %c0_i32, %c0_i32_0 : i32, i32
  }
  func.func @transform_3(%arg0: i32) -> (i32, i32) {
    %c0_i32 = arith.constant 0 : i32
    %c0_i32_0 = arith.constant 0 : i32
    %c0_i32_1 = arith.constant 0 : i32
    return %c0_i32, %c0_i32_0 : i32, i32
  }
  func.func @transform_4(%arg0: i32) -> (i32, i32) {
    %c0_i32 = arith.constant 0 : i32
    %c0_i32_0 = arith.constant 0 : i32
    %c0_i32_1 = arith.constant 0 : i32
    return %c0_i32, %c0_i32_0 : i32, i32
  }
  func.func @transform_5(%arg0: i32) -> (i32, i32) {
    %c0_i32 = arith.constant 0 : i32
    %c0_i32_0 = arith.constant 0 : i32
    %c0_i32_1 = arith.constant 0 : i32
    return %c0_i32, %c0_i32_0 : i32, i32
  }
  func.func @transform_6(%arg0: i32) -> (i32, i32, i32) {
    %c0_i32 = arith.constant 0 : i32
    %c0_i32_0 = arith.constant 0 : i32
    %c0_i32_1 = arith.constant 0 : i32
    return %arg0, %c0_i32, %c0_i32_0 : i32, i32, i32
  }
  func.func @transform_7(%arg0: i32) -> (i32, i32, i32) {
    %c0_i32 = arith.constant 0 : i32
    %c0_i32_0 = arith.constant 0 : i32
    %c0_i32_1 = arith.constant 0 : i32
    return %arg0, %c0_i32, %c0_i32_0 : i32, i32, i32
  }
}

</mosaic_0001>

<bundles_post_ra>
// kernel: tpu_custom_call.1
= control target key start
LH: loop header
LB: loop body
LE: loop exit
PB: predicated region body
PF: predicated region fallthrough
CT: control target
= control target key end

     0   :  { %12 = vsyncpa [#allocation6], 0  ;;  %s3694_s0 = inlined_call_operand.hbm [shape: bf16[2,2,32,128], index: 0, kind: input, shape index: {}]   ;;  %s3695_s1 = inlined_call_operand.hbm [shape: bf16[640,128], index: 1, kind: input, shape index: {}]   ;;  %s3696_s2 = inlined_call_operand.hbm [shape: bf16[640,128], index: 2, kind: input, shape index: {}]   ;;  %s3697_s3 = inlined_call_operand.hbm [shape: bf16[640,128], index: 3, kind: input, shape index: {}]   ;;  %s3698_s4 = inlined_call_operand.hbm [shape: bf16[128,256], index: 4, kind: input, shape index: {}]   ;;  %s3699_s5 = inlined_call_operand.vmem [shape: f32[12,128], index: 5, kind: input, shape index: {}]   ;;  %s3700_s6 = inlined_call_operand.vmem [shape: f32[2,1,128], index: 6, kind: input, shape index: {}]   ;;  %s3701_s7 = inlined_call_operand.hbm [shape: f32[2,1,384], index: 7, kind: output, shape index: {}]  }
   0x1   :  { %14 = vsyncpa [#allocation6 + $0x1], 0 }
   0x2   :  { %15 = vsyncpa [#allocation9], 0 }
   0x3   :  { %16 = vsyncpa [#allocation12], 0 }
   0x4   :  { %17 = vsyncpa [#allocation7], 0 }
   0x5   :  { %19 = vsyncpa [#allocation7 + $0x1], 0  ;;  %s3303_s24 = smov 0   ;;  %s3305_s25 = smov 0  }
   0x6   :  { %s3307_s26 = smov 0   ;;  %s3309_s27 = smov 0  }
   0x7 LB: > { %s3324_s28 = sadd.s32 4294967295, %s3247_s27   ;;  %s2355_s29 = sadd.s32 4294967294, %s3247_s27   ;;  %s3247_s27 = sphi %s3309_s27, %s3727_s27   ;;  %s3243_s26 = sphi %s3307_s26, %s3726_s26   ;;  %s3239_s25 = sphi %s3305_s25, %s3725_s25   ;;  %s3235_s24 = sphi %s3303_s24, %s3724_s24  }
   0x8   : > { %p45_p0 = scmp.ne.s32.totalorder %s3239_s25, %s3235_s24  ;;  %p3702_p1 = scmp.eq.s32.totalorder %s3324_s28, 0 }
   0x9   : > { %p206_p3 = scmp.eq.s32.totalorder %s2355_s29, 1  ;;  %p2356_p5 = scmp.ge.s32.totalorder %s3247_s27, 1 }
   0xa   : > { %p3333_p4 = por %p3702_p1, %p45_p0  ;;  %p213_p7 = scmp.lt.s32.totalorder %s3247_s27, 3 }
   0xb   : > { %p3338_p6 = por %p206_p3, %p45_p0  ;;  %s3249_s10 = smov [#allocation8]  }
   0xc   : > { %s3706_s30 = scalar_select %p3333_p4, 1, 0 }
   0xd   : > { %s3707_s8 = scalar_select %p3338_p6, 1, 0 }
   0xe   : > { %p3343_p8 = pnand %p2356_p5, %p213_p7  ;;  %s225_s11 = sshll.u32 %s3249_s10, 4  ;;  %s3347_s11 = int_to_ptr.vmem [resolvable:$true] %s225_s11 }
   0xf   : > { %3708 = sst [smem:[#allocation19_spill]] %s3707_s8  ;;  %s3250_s13 = smov [#allocation11]  }
  0x10   : > { %s3709_s9 = scalar_select %p3343_p8, 1, 0 }
  0x11   : > { %p2800_p9 = pneg %p3343_p8  ;;  %s251_s14 = sshll.u32 %s3250_s13, 4  ;;  %s3358_s14 = int_to_ptr.vmem [resolvable:$true] %s251_s14 }
  0x12   : > { %s3251_s15 = smov [#allocation10]   ;;  %s3031_s19 = scalar_lea.hbm %s3695_s1, 5120 }
  0x13   : > { %p3354_p11 = pnand %p2800_p9, %p3702_p1  ;;  %s3360_s16 = sshll.u32 %s3251_s15, 4  ;;  %s239_s16 = int_to_ptr.vmem [resolvable:$true] %s3360_s16 }
  0x14   : > { %p3032_p12 = scmp.ne.s32.totalorder %s3695_s1, %s3031_s19  ;;  %p3038_p5 = scmp.lt.u32.totalorder %s3031_s19, %s3695_s1 }
  0x15   : > { %p3370_p13 = pneg %p3354_p11 }
  0x17   : > { %p3034_p0 = pnand %p3370_p13, %p3032_p12 }
  0x19   : > { %p3035_p3 = pneg %p3034_p0 }
  0x1b   : > { %p3040_p7 = pnand %p3038_p5, %p3035_p3 }
  0x1d   : > { %3043 = shalt.err (!%p3040_p7)
}
  0x1e   : > { %s3044_s10 = scalar_lea.vmem %s3347_s11, 5120  ;;  %p3052_p2 = scmp.lt.s32.totalorder %s3347_s11, %s3347_s11 }
  0x1f   : > { %p3045_p9 = scmp.ne.s32.totalorder %s3347_s11, %s3044_s10  ;;  %p3053_p6 = scmp.lt.s32.totalorder %s3044_s10, %s3044_s10 }
  0x21   : > { %p3047_p10 = pnand %p3045_p9, %p3370_p13  ;;  %p3054_p12 = por %p3053_p6, %p3052_p2 }
  0x23   : > { %p3048_p1 = pneg %p3047_p10 }
  0x25   : > { %p3055_p0 = pnand %p3054_p12, %p3048_p1 }
  0x27   : > { %3058 = shalt.err (!%p3055_p0)
}
  0x28   : > { %s3252_s13 = smov 64   ;;  %s3253_s15 = smov 4  }
  0x29   : > { %2803 = dma.hbm_to_vmem [thread:$0]  (!%p3354_p11), %s3695_s1, 5120, %s3347_s11, [#allocation9], %s3252_s13, %s3252_s13, %s3253_s15  }
  0x2a   : > { %s3059_s21 = scalar_lea.hbm %s3697_s3, 5120 }
  0x2b   : > { %p3060_p1 = scmp.ne.s32.totalorder %s3697_s3, %s3059_s21  ;;  %p3066_p10 = scmp.lt.u32.totalorder %s3059_s21, %s3697_s3 }
  0x2d   : > { %p3062_p2 = pnand %p3060_p1, %p3370_p13 }
  0x2f   : > { %p3063_p6 = pneg %p3062_p2 }
  0x31   : > { %p3068_p3 = pnand %p3066_p10, %p3063_p6 }
  0x33   : > { %3071 = shalt.err (!%p3068_p3)
}
  0x34   : > { %s3072_s11 = scalar_lea.vmem %s3358_s14, 5120  ;;  %p3080_p12 = scmp.lt.s32.totalorder %s3358_s14, %s3358_s14 }
  0x35   : > { %p3073_p5 = scmp.ne.s32.totalorder %s3358_s14, %s3072_s11  ;;  %p3081_p0 = scmp.lt.s32.totalorder %s3072_s11, %s3072_s11 }
  0x37   : > { %p3075_p7 = pnand %p3073_p5, %p3370_p13  ;;  %p3082_p1 = por %p3081_p0, %p3080_p12 }
  0x39   : > { %p3076_p9 = pneg %p3075_p7 }
  0x3b   : > { %p3083_p2 = pnand %p3082_p1, %p3076_p9 }
  0x3d   : > { %3086 = shalt.err (!%p3083_p2)
}
  0x3e   : > { %2809 = dma.hbm_to_vmem [thread:$0]  (!%p3354_p11), %s3697_s3, 5120, %s3358_s14, [#allocation12], %s3252_s13, %s3252_s13, %s3253_s15  }
  0x3f   : > { %s3087_s20 = scalar_lea.hbm %s3696_s2, 5120 }
  0x40   : > { %p3088_p6 = scmp.ne.s32.totalorder %s3696_s2, %s3087_s20  ;;  %p3094_p5 = scmp.lt.u32.totalorder %s3087_s20, %s3696_s2 }
  0x42   : > { %p3090_p10 = pnand %p3088_p6, %p3370_p13 }
  0x44   : > { %p3091_p3 = pneg %p3090_p10 }
  0x46   : > { %p3096_p7 = pnand %p3094_p5, %p3091_p3 }
  0x48   : > { %3099 = shalt.err (!%p3096_p7)
}
  0x49   : > { %s3100_s11 = scalar_lea.vmem %s239_s16, 5120  ;;  %p3108_p1 = scmp.lt.s32.totalorder %s239_s16, %s239_s16 }
  0x4a   : > { %p3101_p9 = scmp.ne.s32.totalorder %s239_s16, %s3100_s11  ;;  %p3109_p2 = scmp.lt.s32.totalorder %s3100_s11, %s3100_s11 }
  0x4c   : > { %p3103_p12 = pnand %p3101_p9, %p3370_p13  ;;  %p3110_p4 = por %p3109_p2, %p3108_p1 }
  0x4e   : > { %p3104_p0 = pneg %p3103_p12 }
  0x50   : > { %p3111_p8 = pnand %p3110_p4, %p3104_p0 }
  0x52   : > { %3114 = shalt.err (!%p3111_p8)
}
  0x53   : > { %2806 = dma.hbm_to_vmem [thread:$0]  (!%p3354_p11), %s3696_s2, 5120, %s239_s16, [#allocation9], %s3252_s13, %s3252_s13, %s3253_s15  }
  0x54   : > { %s3254_s17 = smov [#allocation13]   ;;  %s3115_s21 = scalar_lea.hbm %s3698_s4, 2048 }
  0x55   : > { %s264_s18 = sshll.u32 %s3254_s17, 4  ;;  %p3116_p4 = scmp.ne.s32.totalorder %s3698_s4, %s3115_s21  ;;  %s265_s18 = int_to_ptr.vmem [resolvable:$true] %s264_s18 }
  0x56   : > { %p3122_p10 = scmp.lt.u32.totalorder %s3115_s21, %s3698_s4 }
  0x57   : > { %p3118_p8 = pnand %p3116_p4, %p3370_p13 }
  0x59   : > { %p3119_p6 = pneg %p3118_p8 }
  0x5b   : > { %p3124_p3 = pnand %p3122_p10, %p3119_p6 }
  0x5d   : > { %3127 = shalt.err (!%p3124_p3)
}
  0x5e   : > { %s3128_s16 = scalar_lea.vmem %s265_s18, 2048  ;;  %p3136_p12 = scmp.lt.s32.totalorder %s265_s18, %s265_s18 }
  0x5f   : > { %p3129_p5 = scmp.ne.s32.totalorder %s265_s18, %s3128_s16  ;;  %p3137_p0 = scmp.lt.s32.totalorder %s3128_s16, %s3128_s16 }
  0x61   : > { %p3131_p7 = pnand %p3129_p5, %p3370_p13  ;;  %p3138_p1 = por %p3137_p0, %p3136_p12 }
  0x63   : > { %p3132_p9 = pneg %p3131_p7 }
  0x65   : > { %p3139_p2 = pnand %p3138_p1, %p3132_p9 }
  0x67   : > { %3142 = shalt.err (!%p3139_p2)
}
  0x68   : > { %s3255_s14 = smov 128   ;;  %s3256_s22 = smov 8  }
  0x69   : > { %2812 = dma.hbm_to_vmem [thread:$0]  (!%p3354_p11), %s3698_s4, 2048, %s265_s18, [#allocation12], %s3255_s14, %s3255_s14, %s3256_s22  }
  0x6a   : > { %s3461_s19 = sadd.s32 1, %s3247_s27   ;;  %s32_s21 = sadd.s32 1, %s3243_s26 }
  0x6b   : > { %s29_s20 = ssub.s32 %s3247_s27, %s3461_s19  ;;  %p39_p4 = scmp.ne.s32.totalorder %s3243_s26, %s3239_s25 }
  0x6c   : > { %p30_p13 = scmp.eq.s32.totalorder %s29_s20, 0  ;;  %p40_p8 = scmp.eq.s32.totalorder %s3247_s27, 0 }
  0x6d   : > { %p3712_p10 = scmp.eq.s32.totalorder %s3324_s28, 1  ;;  %p2825_p5 = scmp.lt.s32.totalorder %s3247_s27, 2 }
  0x6e   : > { %s3470_s23 = scalar_select %p30_p13, %s3243_s26, %s32_s21  }
  0x6f   : > { %p41_p6 = por %p40_p8, %p39_p4  ;;  %p3474_p3 = por %p3712_p10, %p39_p4 }
  0x70   : > { %s281_s12 = sand.u32 1, %s3243_s26   ;;  %s2527_s18 = sshll.u32 %s3247_s27, 9 }
  0x71   : > { %s2362_s10 = sshll.u32 %s281_s12, 5  ;;  %s3484_s14 = scalar_lea.hbm %s3694_s0, %s2527_s18 }
  0x72   : > { %s285_s22 = scalar_lea.vmem [#allocation5], %s2362_s10  ;;  %p3488_p11 = pnand %p2825_p5, %p41_p6 }
  0x73   : > { %s292_s8 = sshll.u32 %s285_s22, 4  ;;  %s3492_s20 = scalar_lea.sflag [#allocation6], %s281_s12  ;;  %s3486_s8 = int_to_ptr.vmem [resolvable:$true] %s292_s8 }
  0x74   : > { %s3143_s21 = scalar_lea.hbm %s3484_s14, 512  ;;  %p3145_p9 = pneg %p3488_p11 }
  0x75   : > { %p3144_p7 = scmp.ne.s32.totalorder %s3484_s14, %s3143_s21  ;;  %s3148_s11 = scalar_lea.hbm %s3694_s0, 1024 }
  0x76   : > { %p3149_p1 = scmp.lt.u32.totalorder %s3484_s14, %s3694_s0  ;;  %p3150_p2 = scmp.lt.u32.totalorder %s3148_s11, %s3143_s21 }
  0x77   : > { %p3146_p12 = pnand %p3145_p9, %p3144_p7  ;;  %p3152_p4 = scmp.lt.u32.totalorder %s3143_s21, %s3484_s14 }
  0x78   : > { %p3151_p13 = por %p3150_p2, %p3149_p1 }
  0x79   : > { %p3147_p0 = pneg %p3146_p12 }
  0x7a   : > { %p3153_p8 = por %p3152_p4, %p3151_p13 }
  0x7c   : > { %p3154_p6 = pnand %p3153_p8, %p3147_p0 }
  0x7e   : > { %3157 = shalt.err (!%p3154_p6)
}
  0x7f   : > { %s3158_s12 = scalar_lea.vmem %s3486_s8, 512  ;;  %s3257_s10 = smov [#allocation5]  }
  0x80   : > { %p3159_p10 = scmp.ne.s32.totalorder %s3486_s8, %s3158_s12  ;;  %s3163_s18 = sshll.u32 %s3257_s10, 4  ;;  %s3164_s18 = int_to_ptr.vmem [resolvable:$false] %s3163_s18 }
  0x81   : > { %s3165_s16 = scalar_lea.vmem %s3164_s18, 1024  ;;  %p3166_p12 = scmp.lt.s32.totalorder %s3486_s8, %s3164_s18 }
  0x82   : > { %p3161_p5 = pnand %p3159_p10, %p3145_p9  ;;  %p3167_p1 = scmp.lt.s32.totalorder %s3165_s16, %s3158_s12 }
  0x84   : > { %p3162_p7 = pneg %p3161_p5  ;;  %p3168_p2 = por %p3167_p1, %p3166_p12 }
  0x86   : > { %p3169_p13 = pnand %p3168_p2, %p3162_p7 }
  0x88   : > { %3172 = shalt.err (!%p3169_p13)
}
  0x89   : > { %2816 = dma.hbm_to_vmem [thread:$0]  (!%p3488_p11), %s3484_s14, 512, %s3486_s8, %s3492_s20, %s3252_s13, %s3252_s13, %s3253_s15  }
  0x8a   : > { %p3715_p9 = scmp.ne.s32.totalorder %s3709_s9, 0 }
  0x8b   : > { %s3526_s21 = sand.u32 (!%p3715_p9), 1, %s3239_s25   ;;  %p3716_p0 = scmp.ne.s32.totalorder (!%p3715_p9), %s3706_s30, 0 }
  0x8c   : > { %310 = sbr.rel (%p3715_p9) target bundleno = 2725 (0xaa5), region = 48  ;;  %s2366_s11 = sshll.u32 (!%p3715_p9), %s3526_s21, 5 }
  0x8d   : > { %s313_s22 = scalar_lea.sflag (!%p3715_p9), [#allocation6], %s3526_s21  ;;  %s3530_s12 = scalar_lea.vmem (!%p3715_p9), [#allocation5], %s2366_s11 }
  0x93   : > { %3218 = dma.done.wait (%p3716_p0), %s313_s22, 512  }
  0x94   : > { %3220 = vsyncadd (%p3716_p0), %s313_s22, 4294966784  ;;  %p3717_p11 = scmp.eq.s32.totalorder %s3324_s28, 0 }
  0x96   : > { %3222 = dma.done.wait (%p3717_p11), [#allocation9], 10240   ;;  %p3718_p4 = pmov %p3717_p11 }
  0x98   : > { %3224 = vsyncadd (%p3718_p4), [#allocation9], 4294957056  ;;  %p3719_p8 = pmov %p3718_p4 }
  0x99   : > { %p3720_p6 = pmov %p3718_p4 }
  0x9a   : > { %3226 = dma.done.wait (%p3719_p8), [#allocation12], 7168  }
  0x9b   : > { %3228 = vsyncadd (%p3720_p6), [#allocation12], 4294960128  ;;  %v2875_v0 = vld [vmem:[#allocation8 + $0x40] sm:$0xff]   ;;  %v2879_v4 = vld [vmem:[#allocation8 + $0x48] sm:$0xff]   ;;  %vm414_vm0 = vsmask.f32 7424 }
  0x9c   : > { %v2876_v1 = vld [vmem:[#allocation8] sm:$0xff]   ;;  %2528 = vmatprep.subr.bf16.mxu0 %v2875_v0  ;;  %v2880_v5 = vld [vmem:[#allocation8 + $0x8] sm:$0xff]   ;;  %v2883_v8 = vld [vmem:[#allocation8 + $0x50] sm:$0xff]   ;;  %vm449_vm1 = vcmask 1046528   ;;  %vm928_vm2 = vcmask 1045504   ;;  %vm3259_vm3 = vmmov 0  }
  0x9d   : > { %v2877_v2 = vld [vmem:[#allocation8 + $0xc0] sm:$0xff]   ;;  %2529 = vmatpush3.bf16.msra.mxu0 %v2876_v1  ;;  %v2881_v6 = vld [vmem:[#allocation8 + $0xc8] sm:$0xff]   ;;  %v2884_v9 = vld [vmem:[#allocation8 + $0x10] sm:$0xff]   ;;  %vm1472_vm4 = vcmask 1044480   ;;  %p366_p10 = scmp.lt.s32.totalorder %s3324_s28, 1  ;;  %s2224_s18 = scalar_lea.sflag [#allocation7], %s3526_s21 }
  0x9e   : > { %v2878_v3 = vld [vmem:[#allocation8 + $0x80] sm:$0xff]   ;;  %2556 = vmatprep.subr.bf16.mxu1 %v2877_v2  ;;  %2530 = vmatprep.subr.bf16.mxu0 %v2879_v4  ;;  %v2882_v7 = vld [vmem:[#allocation8 + $0x88] sm:$0xff]   ;;  %v2885_v10 = vld [vmem:[#allocation8 + $0xd0] sm:$0xff]  }
  0x9f   : > { %2557 = vmatpush3.bf16.msra.mxu1 %v2878_v3  ;;  %v2886_v11 = vld [vmem:[#allocation8 + $0x90] sm:$0xff]   ;;  %v2887_v12 = vld [vmem:[#allocation8 + $0x58] sm:$0xff]   ;;  %v2891_v16 = vld [vmem:[#allocation8 + $0x60] sm:$0xff]   ;;  %s367_s16 = scalar_select %p366_p10, %s3324_s28, 1 }
  0xa0   : > { %2558 = vmatprep.subr.bf16.mxu1 %v2881_v6  ;;  %v2888_v13 = vld [vmem:[#allocation8 + $0x18] sm:$0xff]   ;;  %v2892_v17 = vld [vmem:[#allocation8 + $0x20] sm:$0xff]   ;;  %v2895_v20 = vld [vmem:[#allocation8 + $0x68] sm:$0xff]  }
  0xa1   : > { %2531 = vmatpush3.bf16.msra.mxu0 %v2880_v5  ;;  %v2889_v14 = vld [vmem:[#allocation8 + $0xd8] sm:$0xff]   ;;  %v2893_v18 = vld [vmem:[#allocation8 + $0xe0] sm:$0xff]   ;;  %v2896_v21 = vld [vmem:[#allocation8 + $0x28] sm:$0xff]  }
  0xa2   : > { %2532 = vmatprep.subr.bf16.mxu0 %v2883_v8  ;;  %v2890_v15 = vld [vmem:[#allocation8 + $0x98] sm:$0xff]   ;;  %v2894_v19 = vld [vmem:[#allocation8 + $0xa0] sm:$0xff]   ;;  %v2897_v22 = vld [vmem:[#allocation8 + $0xe8] sm:$0xff]  }
  0xa3   : > { %2559 = vmatpush3.bf16.msra.mxu1 %v2882_v7  ;;  %v2898_v23 = vld [vmem:[#allocation8 + $0xa8] sm:$0xff]   ;;  %v2899_v24 = vld [vmem:[#allocation8 + $0x70] sm:$0xff]   ;;  %v2903_v28 = vld [vmem:[#allocation8 + $0x78] sm:$0xff]  }
  0xa4   : > { %2560 = vmatprep.subr.bf16.mxu1 %v2885_v10  ;;  %v2900_v25 = vld [vmem:[#allocation8 + $0x30] sm:$0xff]   ;;  %v2904_v29 = vld [vmem:[#allocation8 + $0x38] sm:$0xff]   ;;  %v2908_v33 = vld [vmem:[%s3530_s12] sm:$0xff]  }
  0xa5   : > { %2533 = vmatpush3.bf16.msra.mxu0 %v2884_v9  ;;  %v2901_v26 = vld [vmem:[#allocation8 + $0xf0] sm:$0xff]   ;;  %v2905_v30 = vld [vmem:[#allocation8 + $0xf8] sm:$0xff]   ;;  %v2909_v35 = vld [vmem:[#allocation8 + $0x100] sm:$0xff]   ;;  %v416_v38 = vshrl.u32 %v2908_v33, 16  ;;  %v418_v42 = vshll.u32 %v2908_v33, 16  ;;  %v450_v58 = vrot.slane %v2908_v33, 1 }
  0xa6   : > { %2534 = vmatprep.subr.bf16.mxu0 %v2887_v12  ;;  %v2902_v27 = vld [vmem:[#allocation8 + $0xb0] sm:$0xff]   ;;  %v2907_v32 = vld [vmem:[#allocation8 + $0xb8] sm:$0xff]   ;;  %v2911_v40 = vld [vmem:[%s3530_s12 + $0x8] sm:$0xff]  }
  0xa7   : > { %2561 = vmatpush3.bf16.msra.mxu1 %v2886_v11  ;;  %v2906_v31 = vld [vmem:[%s3530_s12 + $0x10] sm:$0xff]   ;;  %v2910_v37 = vld [vmem:[%s3530_s12 + $0x18] sm:$0xff]   ;;  %v423_v44 = vshll.u32 %v2911_v40, 16  ;;  %v2912_v45 = vld [vmem:[#allocation8 + $0x108] sm:$0xff]   ;;  %v420_v47 = vrot.slane %v418_v42, 1  ;;  %v427_v57 = vshrl.u32 %v2911_v40, 16 }
  0xa8   : > { %2562 = vmatprep.subr.bf16.mxu1 %v2889_v14  ;;  %811 = vmatprep.mubr.bf16.mxu0 %v2906_v31  ;;  %v433_v34 = vshrl.u32 %v2906_v31, 16  ;;  %v435_v36 = vshll.u32 %v2906_v31, 16  ;;  %v440_v41 = vshll.u32 %v2910_v37, 16  ;;  %v2913_v48 = vld [vmem:[#allocation8 + $0x110] sm:$0xff]   ;;  %v2914_v52 = vld [vmem:[#allocation8 + $0x118] sm:$0xff]   ;;  %v444_v53 = vshrl.u32 %v2910_v37, 16 }
  0xa9   : > { %2535 = vmatpush3.bf16.msra.mxu0 %v2888_v13  ;;  %v425_v49 = vrot.slane %v423_v44, 1  ;;  %v421_v51 = vor.u32 %v420_v47, %v416_v38  ;;  %v2915_v55 = vld [vmem:[#allocation8 + $0x120] sm:$0xff]   ;;  %v451_v59 = vrot.slane %v2911_v40, 1  ;;  %v2916_v61 = vld [vmem:[#allocation8 + $0x128] sm:$0xff]   ;;  %v2917_v63 = vld [vmem:[#allocation8 + $0x130] sm:$0xff]  }
  0xaa   : > { %2536 = vmatprep.subr.bf16.mxu0 %v2891_v16  ;;  %v437_v39 = vrot.slane %v435_v36, 1  ;;  %v442_v46 = vrot.slane %v440_v41, 1  ;;  %v2918_v0 = vld [vmem:[#allocation8 + $0x138] sm:$0xff]   ;;  %v2379_v7 = vld [vmem:[%s3699_s5] ss:$0 sm:$0xff] }
  0xab   : > { %2563 = vmatpush3.bf16.msra.mxu1 %v2890_v15  ;;  %v426_v54 = vsel %vm414_vm0, %v421_v51, %v425_v49  ;;  %v452_v60 = vsel %vm449_vm1, %v450_v58, %v451_v59  ;;  %v429_v62 = vor.u32 %v427_v57, %v425_v49 }
  0xac   : > { %2564 = vmatprep.subr.bf16.mxu1 %v2893_v18  ;;  %v438_v43 = vor.u32 %v437_v39, %v433_v34  ;;  %v446_v56 = vor.u32 %v444_v53, %v442_v46 }
  0xad   : > { %2537 = vmatpush3.bf16.msra.mxu0 %v2892_v17 }
  0xae   : > { %2538 = vmatprep.subr.bf16.mxu0 %v2895_v20  ;;  %v443_v50 = vsel %vm414_vm0, %v438_v43, %v442_v46 }
  0xaf   : > { %2565 = vmatpush3.bf16.msra.mxu1 %v2894_v19  ;;  %860 = vmatprep.mubr.bf16.mxu1 %v443_v50 }
  0xb0   : > { %2566 = vmatprep.subr.bf16.mxu1 %v2897_v22 }
  0xb1   : > { %2539 = vmatpush3.bf16.msra.mxu0 %v2896_v21 }
  0xb2   : > { %2540 = vmatprep.subr.bf16.mxu0 %v2899_v24 }
  0xb3   : > { %2567 = vmatpush3.bf16.msra.mxu1 %v2898_v23 }
  0xb4   : > { %2568 = vmatprep.subr.bf16.mxu1 %v2901_v26 }
  0xb5   : > { %2541 = vmatpush3.bf16.msra.mxu0 %v2900_v25 }
  0xb6   : > { %2542 = vmatprep.subr.bf16.mxu0 %v2903_v28 }
  0xb7   : > { %2569 = vmatpush3.bf16.msra.mxu1 %v2902_v27 }
  0xb8   : > { %2570 = vmatprep.subr.bf16.mxu1 %v2905_v30 }
  0xb9   : > { %2543 = vmatpush3.bf16.msra.mxu0 %v2904_v29 }
  0xba   : > { %2700 = vmatprep.subr.bf16.mxu0 %v2909_v35 }
  0xbb   : > { %2571 = vmatpush3.bf16.msra.mxu1 %v2907_v32 }
  0xbc   : > { %812 = vmatmul.mubr.bf16.vlgmr.msra.gmra.mrb[0].mxu0 %v2908_v33 }
  0xbd   : > { %2701 = vmatpush3.bf16.msra.mxu0 %v2909_v35  ;;  %819 = vmatprep.mubr.bf16.mxu0 %v2910_v37 }
  0xbe   : > { %2702 = vmatprep.subr.bf16.mxu0 %v2912_v45  ;;  %861 = vmatmul.mubr.bf16.vlgmr.msra.gmra.mrb[0].mxu1 %v426_v54 }
  0xbf   : > { %868 = vmatprep.mubr.bf16.mxu1 %v446_v56 }
  0xc1   : > { %2703 = vmatpush3.bf16.msra.mxu0 %v2912_v45 }
  0xc2   : > { %2704 = vmatprep.subr.bf16.mxu0 %v2913_v48 }
  0xc4   : > { %820 = vmatmul.mubr.bf16.gmra.mrb[4].mxu0 %v2911_v40 }
  0xc5   : > { %2705 = vmatpush3.bf16.msra.mxu0 %v2913_v48  ;;  %2716 = vmatprep.mubr.bf16.mxu0 %v452_v60 }
  0xc6   : > { %2706 = vmatprep.subr.bf16.mxu0 %v2914_v52  ;;  %869 = vmatmul.mubr.bf16.gmra.mrb[4].mxu1 %v429_v62 }
  0xc9   : > { %2707 = vmatpush3.bf16.msra.mxu0 %v2914_v52 }
  0xca   : > { %2708 = vmatprep.subr.bf16.mxu0 %v2915_v55 }
  0xcd   : > { %2709 = vmatpush3.bf16.msra.mxu0 %v2915_v55 }
  0xce   : > { %2710 = vmatprep.subr.bf16.mxu0 %v2916_v61 }
  0xd1   : > { %2711 = vmatpush3.bf16.msra.mxu0 %v2916_v61 }
  0xd2   : > { %2712 = vmatprep.subr.bf16.mxu0 %v2917_v63 }
  0xd5   : > { %2713 = vmatpush3.bf16.msra.mxu0 %v2917_v63 }
  0xd6   : > { %2714 = vmatprep.subr.bf16.mxu0 %v2918_v0 }
  0xd9   : > { %2715 = vmatpush3.bf16.msra.mxu0 %v2918_v0 }
  0xdc   : > { %2717 = vmatmul.mubr.bf16.vlgmr.msra.gmra.mrb[8].mxu0 %v451_v59 }
 0x18f   : > { %v2544_v1 = vpop.f32.mrb[0].mxu0 }
 0x190   : > { %v2545_v2 = vpop.f32.mrb[1].mxu0 }
 0x191   : > { %v2546_v3 = vadd.f32 %v2545_v2, %v2544_v1  ;;  %v2547_v4 = vpop.f32.mrb[2].mxu0  ;;  %v2572_v10 = vpop.f32.mrb[0].mxu1  ;;  %v2919_v2 = vld [vmem:[#allocation10 + $0x40] sm:$0xff]  }
 0x192   : > { %v2548_v5 = vpop.f32.mrb[3].mxu0  ;;  %v2573_v12 = vpop.f32.mrb[1].mxu1  ;;  %2594 = vmatprep.subr.bf16.mxu1 %v2919_v2 }
 0x193   : > { %v2549_v6 = vadd.f32 %v2548_v5, %v2547_v4  ;;  %v814_v9 = vadd.f32 %v2546_v3, %v2379_v7  ;;  %v2574_v16 = vadd.f32 %v2573_v12, %v2572_v10  ;;  %v2575_v17 = vpop.f32.mrb[2].mxu1  ;;  %v2920_v3 = vld [vmem:[#allocation10] sm:$0xff]   ;;  %v2921_v4 = vld [vmem:[#allocation10 + $0x48] sm:$0xff]   ;;  %v2926_v10 = vld [vmem:[#allocation10 + $0x10] sm:$0xff]  }
 0x194   : > { %v2576_v19 = vpop.f32.mrb[3].mxu1  ;;  %v2923_v5 = vld [vmem:[#allocation10 + $0xc0] sm:$0xff]   ;;  %2595 = vmatpush3.bf16.msra.mxu1 %v2920_v3 }
 0x195   : > { %v817_v15 = vadd.f32 %v2549_v6, %v2379_v7  ;;  %v2577_v21 = vadd.f32 %v2576_v19, %v2575_v17  ;;  %v863_v22 = vadd.f32 %v2574_v16, %v814_v9  ;;  %v2925_v6 = vld [vmem:[#allocation10 + $0x80] sm:$0xff]   ;;  %2616 = vmatprep.subr.bf16.mxu0 %v2923_v5  ;;  %2596 = vmatprep.subr.bf16.mxu1 %v2921_v4  ;;  %v2924_v9 = vld [vmem:[#allocation10 + $0x50] sm:$0xff]   ;;  %v2930_v17 = vld [vmem:[#allocation10 + $0x18] sm:$0xff]  }
 0x196   : > { %2617 = vmatpush3.bf16.msra.mxu0 %v2925_v6  ;;  %v2931_v19 = vld [vmem:[#allocation10 + $0xd0] sm:$0xff]   ;;  %v2949_v4 = vld [vmem:[#allocation10 + $0x100] sm:$0xff]  }
 0x197   : > { %v2550_v8 = vpop.f32.mrb[4].mxu0  ;;  %v866_v23 = vadd.f32 %v2577_v21, %v817_v15  ;;  %v2929_v15 = vld [vmem:[#allocation10 + $0x88] sm:$0xff]   ;;  %v2933_v21 = vld [vmem:[#allocation10 + $0x90] sm:$0xff]  }
 0x198   : > { %v2551_v11 = vpop.f32.mrb[5].mxu0 }
 0x199   : > { %v2552_v13 = vadd.f32 %v2551_v11, %v2550_v8  ;;  %v2553_v14 = vpop.f32.mrb[6].mxu0  ;;  %v2578_v25 = vpop.f32.mrb[4].mxu1  ;;  %v2922_v8 = vld [vmem:[#allocation10 + $0x8] sm:$0xff]  }
 0x19a   : > { %v2554_v18 = vpop.f32.mrb[7].mxu0  ;;  %v2579_v26 = vpop.f32.mrb[5].mxu1  ;;  %2597 = vmatpush3.bf16.msra.mxu1 %v2922_v8  ;;  %v2952_v8 = vld [vmem:[#allocation10 + $0x108] sm:$0xff]  }
 0x19b   : > { %v2555_v20 = vadd.f32 %v2554_v18, %v2553_v14  ;;  %v822_v24 = vadd.f32 %v2552_v13, %v2379_v7  ;;  %v2580_v28 = vadd.f32 %v2579_v26, %v2578_v25  ;;  %v2581_v29 = vpop.f32.mrb[6].mxu1  ;;  %2598 = vmatprep.subr.bf16.mxu1 %v2924_v9  ;;  %v2928_v14 = vld [vmem:[#allocation10 + $0x58] sm:$0xff]   ;;  %v2936_v25 = vld [vmem:[#allocation10 + $0x68] sm:$0xff]  }
 0x19c   : > { %v2582_v30 = vpop.f32.mrb[7].mxu1  ;;  %v2937_v26 = vld [vmem:[#allocation10 + $0x98] sm:$0xff]  }
 0x19d   : > { %v825_v27 = vadd.f32 %v2555_v20, %v2379_v7  ;;  %v2583_v31 = vadd.f32 %v2582_v30, %v2581_v29  ;;  %v871_v32 = vadd.f32 %v2580_v28, %v822_v24  ;;  %v2927_v7 = vld [vmem:[#allocation10 + $0xc8] sm:$0xff]   ;;  %v2932_v20 = vld [vmem:[#allocation10 + $0x60] sm:$0xff]   ;;  %v2935_v24 = vld [vmem:[#allocation10 + $0xd8] sm:$0xff]  }
 0x19e   : > { %2618 = vmatprep.subr.bf16.mxu0 %v2927_v7  ;;  %2599 = vmatpush3.bf16.msra.mxu1 %v2926_v10  ;;  %v2938_v28 = vld [vmem:[#allocation10 + $0x28] sm:$0xff]   ;;  %v2939_v29 = vld [vmem:[#allocation10 + $0xe0] sm:$0xff]   ;;  %v2940_v30 = vld [vmem:[#allocation10 + $0x70] sm:$0xff]  }
 0x19f   : > { %v874_v33 = vadd.f32 %v2583_v31, %v825_v27  ;;  %2600 = vmatprep.subr.bf16.mxu1 %v2928_v14  ;;  %2619 = vmatpush3.bf16.msra.mxu0 %v2929_v15  ;;  %v2941_v31 = vld [vmem:[#allocation10 + $0xa0] sm:$0xff]   ;;  %v2953_v15 = vld [vmem:[#allocation10 + $0x110] sm:$0xff]  }
 0x1a0   : > { %2620 = vmatprep.subr.bf16.mxu0 %v2931_v19  ;;  %v2957_v19 = vld [vmem:[#allocation10 + $0x130] sm:$0xff]  }
 0x1a2   : > { %2601 = vmatpush3.bf16.msra.mxu1 %v2930_v17  ;;  %v2955_v17 = vld [vmem:[#allocation10 + $0x120] sm:$0xff]  }
 0x1a3   : > { %2602 = vmatprep.subr.bf16.mxu1 %v2932_v20  ;;  %2621 = vmatpush3.bf16.msra.mxu0 %v2933_v21  ;;  %v2958_v20 = vld [vmem:[#allocation10 + $0x138] sm:$0xff]  }
 0x1a4   : > { %2622 = vmatprep.subr.bf16.mxu0 %v2935_v24 }
 0x1a7   : > { %2623 = vmatpush3.bf16.msra.mxu0 %v2937_v26 }
 0x1a8   : > { %2624 = vmatprep.subr.bf16.mxu0 %v2939_v29 }
 0x1ab   : > { %2625 = vmatpush3.bf16.msra.mxu0 %v2941_v31 }
 0x1af   : > { %v2718_v34 = vpop.f32.mrb[8].mxu0 }
 0x1b0   : > { %v920_v35 = vadd.f32 %v2718_v34, %v871_v32  ;;  %v911_v36 = vpop.f32.mrb[9].mxu0  ;;  %v2942_v32 = vld [vmem:[#allocation10 + $0x30] sm:$0xff]   ;;  %v2944_v34 = vld [vmem:[#allocation10 + $0x78] sm:$0xff]  }
 0x1b1   : > { %v912_v37 = vadd.f32 %v911_v36, %v863_v22  ;;  %v2719_v38 = vpop.f32.mrb[10].mxu0  ;;  %v2946_v36 = vld [vmem:[#allocation10 + $0x38] sm:$0xff]  }
 0x1b2   : > { %v923_v39 = vadd.f32 %v2719_v38, %v874_v33  ;;  %v914_v40 = vpop.f32.mrb[11].mxu0  ;;  %v2943_v33 = vld [vmem:[#allocation10 + $0xe8] sm:$0xff]   ;;  %v2948_v38 = vld [vmem:[#allocation10 + $0xb0] sm:$0xff]  }
 0x1b3   : > { %v915_v41 = vadd.f32 %v914_v40, %v866_v23  ;;  %v2934_v23 = vld [vmem:[#allocation10 + $0x20] sm:$0xff]   ;;  %2626 = vmatprep.subr.bf16.mxu0 %v2943_v33  ;;  %v3258_v40 = vmov 0.0  }
 0x1b4   : > { %v929_v44 = vsel %vm928_vm2, %v923_v39, 0.0  ;;  %2603 = vmatpush3.bf16.msra.mxu1 %v2934_v23 }
 0x1b5   : > { %v926_v42 = vadd.f32 %v915_v41, %v912_v37  ;;  %2604 = vmatprep.subr.bf16.mxu1 %v2936_v25 }
 0x1b7   : > { %v927_v43 = vadd.f32 %v926_v42, %v920_v35 }
 0x1b8   : > { %2605 = vmatpush3.bf16.msra.mxu1 %v2938_v28  ;;  %v2422_v28 = vld [vmem:[%s3699_s5 + $0x3] ss:$0 sm:$0xff] }
 0x1b9   : > { %v930_v45 = vadd.f32 %v929_v44, %v927_v43  ;;  %2606 = vmatprep.subr.bf16.mxu1 %v2940_v30  ;;  %v2420_v44 = vld [vmem:[%s3699_s5 + $0x1] ss:$0 sm:$0xff] }
 0x1bb   : > { %931 = vadd.xlane.f32.xlu0 %v930_v45 }
 0x1bc   : > { %2607 = vmatpush3.bf16.msra.mxu1 %v2942_v32 }
 0x1bd   : > { %2608 = vmatprep.subr.bf16.mxu1 %v2944_v34 }
 0x1c0   : > { %2609 = vmatpush3.bf16.msra.mxu1 %v2946_v36 }
 0x1c1   : > { %2720 = vmatprep.subr.bf16.mxu1 %v3258_v40 }
 0x248   : > { %v932_v46 = vpop.xlane.xlu0 %931 }
 0x249   : > { %v933_v47 = vrot.slane %v932_v46, 4 }
 0x24b   : > { %v934_v48 = vadd.f32 %v933_v47, %v932_v46 }
 0x24d   : > { %v935_v49 = vrot.slane %v934_v48, 2 }
 0x24f   : > { %v936_v50 = vadd.f32 %v935_v49, %v934_v48 }
 0x251   : > { %v937_v51 = vrot.slane %v936_v50, 1 }
 0x253   : > { %v938_v52 = vadd.f32 %v937_v51, %v936_v50  ;;  %v2421_v50 = vld [vmem:[%s3699_s5 + $0x2] ss:$0 sm:$0xff] }
 0x255   : > { %2761 = vpush %v938_v52 }
 0x286   : > { %s2762_s13 = spop %2761 }
 0x287   : > { %s940_s15 = smul.f32 0.00026041668, %s2762_s13 }
 0x289   : > { %v941_v53 = vstv %s940_s15 }
 0x28a   : > { %v3554_v54 = vsub.f32 %v912_v37, %v941_v53  ;;  %v3556_v55 = vsub.f32 %v915_v41, %v941_v53  ;;  %v3558_v56 = vsub.f32 %v920_v35, %v941_v53  ;;  %v3560_v57 = vsub.f32 %v923_v39, %v941_v53  ;;  %v2945_v35 = vld [vmem:[#allocation10 + $0xa8] sm:$0xff]   ;;  %v2947_v37 = vld [vmem:[#allocation10 + $0xf0] sm:$0xff]   ;;  %v2950_v39 = vld [vmem:[#allocation10 + $0xf8] sm:$0xff]  }
 0x28b   : > { %2627 = vmatpush3.bf16.msra.mxu0 %v2945_v35  ;;  %v2951_v41 = vld [vmem:[#allocation10 + $0xb8] sm:$0xff]  }
 0x28c   : > { %v946_v58 = vmul.f32 %v3554_v54, %v3554_v54  ;;  %v947_v59 = vmul.f32 %v3556_v55, %v3556_v55  ;;  %v949_v60 = vmul.f32 %v3560_v57, %v3560_v57  ;;  %v948_v61 = vmul.f32 %v3558_v56, %v3558_v56  ;;  %2628 = vmatprep.subr.bf16.mxu0 %v2947_v37 }
 0x28e   : > { %v950_v62 = vadd.f32 %v947_v59, %v946_v58  ;;  %v952_v0 = vsel %vm928_vm2, %v949_v60, 0.0 }
 0x28f   : > { %2629 = vmatpush3.bf16.msra.mxu0 %v2948_v38 }
 0x290   : > { %v951_v63 = vadd.f32 %v950_v62, %v948_v61  ;;  %2630 = vmatprep.subr.bf16.mxu0 %v2950_v39 }
 0x292   : > { %v953_v1 = vadd.f32 %v952_v0, %v951_v63 }
 0x293   : > { %2631 = vmatpush3.bf16.msra.mxu0 %v2951_v41 }
 0x294   : > { %954 = vadd.xlane.f32.xlu0 %v953_v1 }
 0x321   : > { %v955_v11 = vpop.xlane.xlu0 %954 }
 0x322   : > { %v956_v12 = vrot.slane %v955_v11, 4 }
 0x324   : > { %v957_v13 = vadd.f32 %v956_v12, %v955_v11 }
 0x326   : > { %v958_v16 = vrot.slane %v957_v13, 2 }
 0x328   : > { %v959_v18 = vadd.f32 %v958_v16, %v957_v13  ;;  %v2954_v16 = vld [vmem:[#allocation10 + $0x118] sm:$0xff]  }
 0x32a   : > { %v960_v22 = vrot.slane %v959_v18, 1 }
 0x32c   : > { %v961_v27 = vadd.f32 %v960_v22, %v959_v18  ;;  %v2956_v18 = vld [vmem:[#allocation10 + $0x128] sm:$0xff]  }
 0x32e   : > { %2763 = vpush %v961_v27 }
 0x35f   : > { %s2764_s14 = spop %2763 }
 0x360   : > { %s963_s8 = smul.f32 0.00026041668, %s2764_s14 }
 0x362   : > { %s964_s17 = sadd.f32 1e-05, %s963_s8 }
 0x364   : > { %v965_v42 = vstv %s964_s17 }
 0x365   : > { %3023 = vrsqrt.f32 %v965_v42 }
 0x36f   : > { %v3024_v43 = vpop.eup %3023 }
 0x370   : > { %2765 = vpush %v3024_v43 }
 0x3a1   : > { %s2766_s20 = spop %2765 }
 0x3a2   : > { %v968_v45 = vstv %s2766_s20 }
 0x3a3   : > { %v969_v46 = vmul.f32 %v968_v45, %v3554_v54  ;;  %v970_v47 = vmul.f32 %v968_v45, %v3556_v55  ;;  %v971_v48 = vmul.f32 %v968_v45, %v3558_v56  ;;  %v972_v49 = vmul.f32 %v968_v45, %v3560_v57 }
 0x3a5   : > { %v977_v51 = vmul.f32 %v2420_v44, %v969_v46  ;;  %v978_v52 = vmul.f32 %v2420_v44, %v970_v47  ;;  %v979_v53 = vmul.f32 %v2420_v44, %v971_v48  ;;  %v980_v58 = vmul.f32 %v2420_v44, %v972_v49 }
 0x3a7   : > { %v985_v59 = vadd.f32 %v2421_v50, %v977_v51  ;;  %v986_v60 = vadd.f32 %v2421_v50, %v978_v52  ;;  %v987_v61 = vadd.f32 %v2421_v50, %v979_v53  ;;  %v988_v62 = vadd.f32 %v2421_v50, %v980_v58 }
 0x3a9   : > { %v989_v63 = vmax.f32 %v985_v59, 0.0  ;;  %v990_v54 = vmax.f32 %v986_v60, 0.0  ;;  %v991_v0 = vmax.f32 %v987_v61, 0.0  ;;  %v992_v55 = vmax.f32 %v988_v62, 0.0 }
 0x3ab   : > { %993 = vst [vmem:[#allocation2] sm:$0xff] %v989_v63  ;;  %994 = vst [vmem:[#allocation2 + $0x8] sm:$0xff] %v990_v54 }
 0x3ac   : > { %995 = vst [vmem:[#allocation2 + $0x10] sm:$0xff] %v991_v0  ;;  %996 = vst [vmem:[#allocation2 + $0x18] sm:$0x3f] %v992_v55  ;;  %v2959_v55 = vld [vmem:[#allocation11 + $0x40] sm:$0xff]  }
 0x3ad   : > { %2647 = vmatprep.subr.bf16.mxu0 %v2959_v55 }
 0x3b2   : > { %v1002_v56 = vld [vmem:[#allocation2 + $0x1] ss:$2 sm:$0xff]  ;;  %v997_v2 = vld [vmem:[#allocation2] ss:$2 sm:$0xff] }
 0x3b3   : > { %v1004_v57 = vld [vmem:[#allocation2 + $0x11] ss:$2 sm:$0x3f]  ;;  %v999_v3 = vld [vmem:[#allocation2 + $0x10] ss:$2 sm:$0x7f] }
 0x3b4   : > { %v1005_v1 = vpack.c.bf16 %v1004_v57, %v1002_v56  ;;  %v1000_v5 = vpack.c.bf16 %v999_v3, %v997_v2  ;;  %v2960_v56 = vld [vmem:[#allocation11] sm:$0xff]   ;;  %v2961_v57 = vld [vmem:[#allocation11 + $0x48] sm:$0xff]  }
 0x3b5   : > { %v2965_v2 = vld [vmem:[#allocation11 + $0x80] sm:$0xff]   ;;  %v2967_v3 = vld [vmem:[#allocation11 + $0xc8] sm:$0xff]  }
 0x3b6   : > { %1381 = vmatprep.mubr.bf16.mxu1 %v1005_v1  ;;  %v1017_v6 = vshll.u32 %v1005_v1, 16  ;;  %v1009_v7 = vshll.u32 %v1000_v5, 16  ;;  %v1015_v9 = vshrl.u32 %v1005_v1, 16  ;;  %v1007_v11 = vshrl.u32 %v1000_v5, 16  ;;  %v2963_v1 = vld [vmem:[#allocation11 + $0xc0] sm:$0xff]  }
 0x3b7   : > { %1382 = vmatmul.mubr.bf16.vlgmr.msra.gmra.mrb[8].mxu1 %v1000_v5  ;;  %v1023_v21 = vrot.slane %v1000_v5, 1  ;;  %v2964_v5 = vld [vmem:[#allocation11 + $0x50] sm:$0xff]  }
 0x3b8   : > { %2721 = vmatpush3.bf16.msra.mxu1 %v2949_v4  ;;  %v1019_v10 = vrot.slane %v1017_v6, 1  ;;  %2736 = vmatprep.mubr.msk.bf16.mxu1 %vm3259_vm3, %v3258_v40  ;;  %v1011_v12 = vrot.slane %v1009_v7, 1  ;;  %v2962_v4 = vld [vmem:[#allocation11 + $0x8] sm:$0xff]   ;;  %v2966_v6 = vld [vmem:[#allocation11 + $0x10] sm:$0xff]  }
 0x3b9   : > { %2722 = vmatprep.subr.bf16.mxu1 %v3258_v40 }
 0x3ba   : > { %v1020_v13 = vor.u32 %v1019_v10, %v1015_v9  ;;  %v1012_v14 = vor.u32 %v1011_v12, %v1007_v11  ;;  %v2968_v10 = vld [vmem:[#allocation11 + $0x58] sm:$0xff]   ;;  %v2969_v11 = vld [vmem:[#allocation11 + $0x88] sm:$0xff]  }
 0x3bb   : > { %v2970_v12 = vld [vmem:[#allocation11 + $0x18] sm:$0xff]  }
 0x3bc   : > { %2723 = vmatpush3.bf16.msra.mxu1 %v2952_v8  ;;  %1422 = vmatprep.mubr.bf16.mxu0 %v1020_v13 }
 0x3bd   : > { %1423 = vmatmul.mubr.bf16.vlgmr.msra.gmra.mrb[12].mxu0 %v1012_v14  ;;  %2724 = vmatprep.subr.bf16.mxu1 %v3258_v40  ;;  %v2971_v14 = vld [vmem:[#allocation11 + $0xd0] sm:$0xff]  }
 0x3be   : > { %2648 = vmatpush3.bf16.msra.mxu0 %v2960_v56 }
 0x3bf   : > { %2649 = vmatprep.subr.bf16.mxu0 %v2961_v57 }
 0x3c0   : > { %2725 = vmatpush3.bf16.msra.mxu1 %v2953_v15 }
 0x3c1   : > { %2726 = vmatprep.subr.bf16.mxu1 %v3258_v40 }
 0x3c2   : > { %2650 = vmatpush3.bf16.msra.mxu0 %v2962_v4  ;;  %v2996_v4 = vld [vmem:[#allocation11 + $0x128] sm:$0xff]  }
 0x3c3   : > { %2651 = vmatprep.subr.bf16.mxu0 %v2964_v5  ;;  %v2997_v5 = vld [vmem:[#allocation11 + $0x130] sm:$0xff]  }
 0x3c4   : > { %2727 = vmatpush3.bf16.msra.mxu1 %v2954_v16  ;;  %v2972_v16 = vld [vmem:[#allocation11 + $0x60] sm:$0xff]  }
 0x3c5   : > { %2728 = vmatprep.subr.bf16.mxu1 %v3258_v40 }
 0x3c6   : > { %2652 = vmatpush3.bf16.msra.mxu0 %v2966_v6  ;;  %v2998_v6 = vld [vmem:[#allocation11 + $0x138] sm:$0xff]  }
 0x3c7   : > { %2653 = vmatprep.subr.bf16.mxu0 %v2968_v10 }
 0x3c8   : > { %2729 = vmatpush3.bf16.msra.mxu1 %v2955_v17  ;;  %v2973_v17 = vld [vmem:[#allocation11 + $0x90] sm:$0xff]  }
 0x3c9   : > { %2730 = vmatprep.subr.bf16.mxu1 %v3258_v40 }
 0x3ca   : > { %2654 = vmatpush3.bf16.msra.mxu0 %v2970_v12 }
 0x3cb   : > { %2655 = vmatprep.subr.bf16.mxu0 %v2972_v16 }
 0x3cc   : > { %2731 = vmatpush3.bf16.msra.mxu1 %v2956_v18  ;;  %v2974_v18 = vld [vmem:[#allocation11 + $0x20] sm:$0xff]  }
 0x3cd   : > { %2732 = vmatprep.subr.bf16.mxu1 %v3258_v40 }
 0x3ce   : > { %2656 = vmatpush3.bf16.msra.mxu0 %v2974_v18 }
 0x3d0   : > { %2733 = vmatpush3.bf16.msra.mxu1 %v2957_v19 }
 0x3d1   : > { %2734 = vmatprep.subr.bf16.mxu1 %v3258_v40 }
 0x3d4   : > { %2735 = vmatpush3.bf16.msra.mxu1 %v2958_v20  ;;  %v2975_v20 = vld [vmem:[#allocation11 + $0xd8] sm:$0xff]  }
 0x3d5   : > { %2669 = vmatprep.subr.bf16.mxu1 %v2963_v1  ;;  %v2993_v1 = vld [vmem:[#allocation11 + $0x110] sm:$0xff]  }
 0x3d7   : > { %2737 = vmatmul.mubr.bf16.vlgmr.msra.gmra.mrb[12].mxu1 %v1023_v21  ;;  %v2976_v21 = vld [vmem:[#allocation11 + $0x68] sm:$0xff]  }
 0x3d8   : > { %2670 = vmatpush3.bf16.msra.mxu1 %v2965_v2  ;;  %2657 = vmatprep.subr.bf16.mxu0 %v2976_v21  ;;  %v2994_v2 = vld [vmem:[#allocation11 + $0x118] sm:$0xff]  }
 0x3d9   : > { %2671 = vmatprep.subr.bf16.mxu1 %v2967_v3  ;;  %v2995_v3 = vld [vmem:[#allocation11 + $0x120] sm:$0xff]  }
 0x3dc   : > { %2672 = vmatpush3.bf16.msra.mxu1 %v2969_v11 }
 0x3dd   : > { %2673 = vmatprep.subr.bf16.mxu1 %v2971_v14 }
 0x3e0   : > { %2674 = vmatpush3.bf16.msra.mxu1 %v2973_v17 }
 0x3e1   : > { %2675 = vmatprep.subr.bf16.mxu1 %v2975_v20 }
 0x48a   : > { %v2610_v22 = vpop.f32.mrb[8].mxu1 }
 0x48b   : > { %v2611_v23 = vpop.f32.mrb[9].mxu1 }
 0x48c   : > { %v2612_v24 = vadd.f32 %v2611_v23, %v2610_v22  ;;  %v2613_v25 = vpop.f32.mrb[10].mxu1  ;;  %v2977_v22 = vld [vmem:[#allocation11 + $0x98] sm:$0xff]  }
 0x48d   : > { %v2614_v26 = vpop.f32.mrb[11].mxu1  ;;  %2676 = vmatpush3.bf16.msra.mxu1 %v2977_v22 }
 0x48e   : > { %v2615_v27 = vadd.f32 %v2614_v26, %v2613_v25  ;;  %v1384_v31 = vadd.f32 %v2612_v24, %v2422_v28  ;;  %v2978_v24 = vld [vmem:[#allocation11 + $0x28] sm:$0xff]   ;;  %v2979_v25 = vld [vmem:[#allocation11 + $0xe0] sm:$0xff]   ;;  %v2980_v26 = vld [vmem:[#allocation11 + $0x70] sm:$0xff]  }
 0x48f   : > { %2658 = vmatpush3.bf16.msra.mxu0 %v2978_v24  ;;  %2677 = vmatprep.subr.bf16.mxu1 %v2979_v25 }
 0x490   : > { %v2632_v29 = vpop.f32.mrb[12].mxu0  ;;  %v1387_v35 = vadd.f32 %v2615_v27, %v2422_v28  ;;  %v2981_v27 = vld [vmem:[#allocation11 + $0xa0] sm:$0xff]   ;;  %v2982_v28 = vld [vmem:[#allocation11 + $0x30] sm:$0xff]   ;;  %2659 = vmatprep.subr.bf16.mxu0 %v2980_v26 }
 0x491   : > { %v2633_v30 = vpop.f32.mrb[13].mxu0  ;;  %2678 = vmatpush3.bf16.msra.mxu1 %v2981_v27 }
 0x492   : > { %v2634_v32 = vadd.f32 %v2633_v30, %v2632_v29  ;;  %v2635_v33 = vpop.f32.mrb[14].mxu0  ;;  %v2983_v29 = vld [vmem:[#allocation11 + $0xe8] sm:$0xff]   ;;  %v2984_v30 = vld [vmem:[#allocation11 + $0x78] sm:$0xff]  }
 0x493   : > { %v2636_v34 = vpop.f32.mrb[15].mxu0  ;;  %2660 = vmatpush3.bf16.msra.mxu0 %v2982_v28  ;;  %2679 = vmatprep.subr.bf16.mxu1 %v2983_v29 }
 0x494   : > { %v2637_v36 = vadd.f32 %v2636_v34, %v2635_v33  ;;  %v1425_v37 = vadd.f32 %v2634_v32, %v1384_v31  ;;  %v2985_v31 = vld [vmem:[#allocation11 + $0xa8] sm:$0xff]   ;;  %v2986_v32 = vld [vmem:[#allocation11 + $0x38] sm:$0xff]   ;;  %v2987_v33 = vld [vmem:[#allocation11 + $0xf0] sm:$0xff]   ;;  %2661 = vmatprep.subr.bf16.mxu0 %v2984_v30 }
 0x495   : > { %2680 = vmatpush3.bf16.msra.mxu1 %v2985_v31  ;;  %v2988_v34 = vld [vmem:[#allocation11 + $0xb0] sm:$0xff]  }
 0x496   : > { %v1428_v38 = vadd.f32 %v2637_v36, %v1387_v35  ;;  %2681 = vmatprep.subr.bf16.mxu1 %v2987_v33  ;;  %v2990_v35 = vld [vmem:[#allocation11 + $0xf8] sm:$0xff]  }
 0x497   : > { %2662 = vmatpush3.bf16.msra.mxu0 %v2986_v32  ;;  %v2991_v36 = vld [vmem:[#allocation11 + $0xb8] sm:$0xff]  }
 0x498   : > { %2740 = vmatprep.subr.bf16.mxu0 %v3258_v40 }
 0x499   : > { %2682 = vmatpush3.bf16.msra.mxu1 %v2988_v34 }
 0x49a   : > { %2683 = vmatprep.subr.bf16.mxu1 %v2990_v35 }
 0x49d   : > { %2684 = vmatpush3.bf16.msra.mxu1 %v2991_v36 }
 0x4aa   : > { %v1465_v39 = vpop.f32.mrb[12].mxu1 }
 0x4ab   : > { %v1466_v41 = vadd.f32 %v1465_v39, %v1425_v37  ;;  %v2738_v42 = vpop.f32.mrb[13].mxu1  ;;  %v2463_v39 = vld [vmem:[%s3699_s5 + $0x4] ss:$0 sm:$0xff] }
 0x4ac   : > { %v1468_v43 = vpop.f32.mrb[14].mxu1 }
 0x4ad   : > { %v1469_v44 = vadd.f32 %v1468_v43, %v1428_v38  ;;  %v2739_v45 = vpop.f32.mrb[15].mxu1 }
 0x4af   : > { %v1473_v46 = vsel %vm1472_vm4, %v1469_v44, 0.0 }
 0x4b0   : > { %v1474_v47 = vadd.f32 %v1473_v46, %v1466_v41 }
 0x4b2   : > { %1475 = vadd.xlane.f32.xlu1 %v1474_v47 }
 0x53f   : > { %v1476_v48 = vpop.xlane.xlu1 %1475 }
 0x540   : > { %v1477_v49 = vrot.slane %v1476_v48, 4 }
 0x542   : > { %v1478_v50 = vadd.f32 %v1477_v49, %v1476_v48 }
 0x544   : > { %v1479_v51 = vrot.slane %v1478_v50, 2 }
 0x546   : > { %v1480_v52 = vadd.f32 %v1479_v51, %v1478_v50 }
 0x548   : > { %v1481_v53 = vrot.slane %v1480_v52, 1 }
 0x54a   : > { %v1482_v58 = vadd.f32 %v1481_v53, %v1480_v52 }
 0x54c   : > { %2767 = vpush %v1482_v58 }
 0x57d   : > { %s2768_s30 = spop %2767 }
 0x57e   : > { %s1484_s9 = smul.f32 0.00060096156, %s2768_s30 }
 0x580   : > { %v1485_v59 = vstv %s1484_s9 }
 0x581   : > { %v3595_v60 = vsub.f32 %v1466_v41, %v1485_v59  ;;  %v3597_v61 = vsub.f32 %v1469_v44, %v1485_v59  ;;  %v2464_v44 = vld [vmem:[%s3699_s5 + $0x5] ss:$0 sm:$0xff]  ;;  %v2989_v59 = vld [vmem:[#allocation11 + $0x100] sm:$0xff]  }
 0x583   : > { %v1489_v62 = vmul.f32 %v3597_v61, %v3597_v61  ;;  %v1488_v63 = vmul.f32 %v3595_v60, %v3595_v60 }
 0x585   : > { %v1490_v54 = vsel %vm1472_vm4, %v1489_v62, 0.0  ;;  %v2992_v62 = vld [vmem:[#allocation11 + $0x108] sm:$0xff]  }
 0x586   : > { %v1491_v0 = vadd.f32 %v1490_v54, %v1488_v63 }
 0x588   : > { %1492 = vadd.xlane.f32.xlu1 %v1491_v0 }
 0x615   : > { %v1493_v7 = vpop.xlane.xlu1 %1492 }
 0x616   : > { %v1494_v8 = vrot.slane %v1493_v7, 4 }
 0x618   : > { %v1495_v9 = vadd.f32 %v1494_v8, %v1493_v7 }
 0x61a   : > { %v1496_v13 = vrot.slane %v1495_v9, 2 }
 0x61c   : > { %v1497_v15 = vadd.f32 %v1496_v13, %v1495_v9  ;;  %v2465_v13 = vld [vmem:[%s3699_s5 + $0x6] ss:$0 sm:$0xff] }
 0x61e   : > { %v1498_v19 = vrot.slane %v1497_v15, 1 }
 0x620   : > { %v1499_v23 = vadd.f32 %v1498_v19, %v1497_v15 }
 0x622   : > { %2769 = vpush %v1499_v23 }
 0x653   : > { %s2770_s13 = spop %2769 }
 0x654   : > { %s1501_s15 = smul.f32 0.00060096156, %s2770_s13 }
 0x656   : > { %s1502_s14 = sadd.f32 1e-05, %s1501_s15 }
 0x658   : > { %v1503_v37 = vstv %s1502_s14 }
 0x659   : > { %3025 = vrsqrt.f32 %v1503_v37 }
 0x663   : > { %v3026_v38 = vpop.eup %3025 }
 0x664   : > { %2771 = vpush %v3026_v38 }
 0x695   : > { %s2772_s8 = spop %2771 }
 0x696   : > { %v1506_v41 = vstv %s2772_s8 }
 0x697   : > { %v1507_v42 = vmul.f32 %v1506_v41, %v3595_v60  ;;  %v1508_v43 = vmul.f32 %v1506_v41, %v3597_v61 }
 0x699   : > { %v1513_v45 = vmul.f32 %v2463_v39, %v1507_v42  ;;  %v1514_v46 = vmul.f32 %v2463_v39, %v1508_v43  ;;  %v3001_v42 = vld [vmem:[#allocation13 + $0x4] ss:$8 sps:$4 sm:$0xff]   ;;  %v2999_v43 = vld [vmem:[#allocation13] ss:$8 sps:$4 sm:$0xff]  }
 0x69a   : > { %2143 = vmatprep.subr.bf16.mxu1 %v3001_v42 }
 0x69b   : > { %v1519_v47 = vadd.f32 %v2464_v44, %v1513_v45  ;;  %v1520_v48 = vadd.f32 %v2464_v44, %v1514_v46  ;;  %v3004_v46 = vld [vmem:[#allocation13 + $0x14] ss:$8 sps:$4 sm:$0xff]  }
 0x69d   : > { %v1521_v49 = vmax.f32 %v1519_v47, 0.0  ;;  %v1522_v50 = vmax.f32 %v1520_v48, 0.0  ;;  %v3002_v47 = vld [vmem:[#allocation13 + $0x10] ss:$8 sps:$4 sm:$0xff]  }
 0x69f   : > { %1523 = vst [vmem:[#allocation3] sm:$0xff] %v1521_v49  ;;  %1524 = vst [vmem:[#allocation3 + $0x8] sm:$0x1f] %v1522_v50  ;;  %v3007_v49 = vld [vmem:[#allocation13 + $0x24] ss:$8 sps:$4 sm:$0xff]  }
 0x6a0   : > { %v3005_v50 = vld [vmem:[#allocation13 + $0x20] ss:$8 sps:$4 sm:$0xff]  }
 0x6a6   : > { %v1528_v51 = vld [vmem:[#allocation3 + $0x1] ss:$2 sm:$0x3f]  ;;  %v1525_v52 = vld [vmem:[#allocation3] ss:$2 sm:$0x7f] }
 0x6a7   : > { %v1529_v53 = vpack.c.bf16 %v1528_v51, %v1528_v51  ;;  %v1526_v58 = vpack.c.bf16 %v1525_v52, %v1525_v52  ;;  %v3010_v51 = vld [vmem:[#allocation13 + $0x34] ss:$8 sps:$4 sm:$0xff]   ;;  %v3008_v52 = vld [vmem:[#allocation13 + $0x30] ss:$8 sps:$4 sm:$0xff]  }
 0x6a9   : > { %1905 = vmatprep.mubr.bf16.mxu0 %v1529_v53  ;;  %v1541_v60 = vshll.u32 %v1529_v53, 16  ;;  %v1533_v61 = vshll.u32 %v1526_v58, 16  ;;  %v1539_v63 = vshrl.u32 %v1529_v53, 16  ;;  %v1531_v0 = vshrl.u32 %v1526_v58, 16  ;;  %v3013_v53 = vld [vmem:[#allocation13 + $0x44] ss:$8 sps:$4 sm:$0xff]  }
 0x6aa   : > { %1906 = vmatmul.mubr.bf16.vlgmr.msra.gmra.mrb[16].mxu0 %v1526_v58  ;;  %v1547_v7 = vrot.slane %v1526_v58, 1  ;;  %v3011_v58 = vld [vmem:[#allocation13 + $0x40] ss:$8 sps:$4 sm:$0xff]  }
 0x6ab   : > { %2741 = vmatpush3.bf16.msra.mxu0 %v2989_v59  ;;  %v1543_v54 = vrot.slane %v1541_v60, 1  ;;  %v1535_v55 = vrot.slane %v1533_v61, 1  ;;  %2756 = vmatprep.mubr.msk.bf16.mxu0 %vm3259_vm3, %v3258_v40  ;;  %v3014_v59 = vld [vmem:[#allocation13 + $0x50] ss:$8 sps:$4 sm:$0xff]   ;;  %v3016_v60 = vld [vmem:[#allocation13 + $0x54] ss:$8 sps:$4 sm:$0xff]  }
 0x6ac   : > { %2742 = vmatprep.subr.bf16.mxu0 %v3258_v40  ;;  %v3019_v61 = vld [vmem:[#allocation13 + $0x64] ss:$8 sps:$4 sm:$0xff]  }
 0x6ad   : > { %v1544_v56 = vor.u32 %v1543_v54, %v1539_v63  ;;  %v1536_v57 = vor.u32 %v1535_v55, %v1531_v0  ;;  %v3260_v63 = vmov 0   ;;  %v3022_v54 = vld [vmem:[#allocation13 + $0x74] ss:$8 sps:$4 sm:$0xff]   ;;  %v3020_v0 = vld [vmem:[#allocation13 + $0x70] ss:$8 sps:$4 sm:$0xff]  }
 0x6af   : > { %2743 = vmatpush3.bf16.msra.mxu0 %v2992_v62  ;;  %1945 = vmatprep.mubr.bf16.mxu1 %v1544_v56  ;;  %v3017_v62 = vld [vmem:[#allocation13 + $0x60] ss:$8 sps:$4 sm:$0xff]  }
 0x6b0   : > { %1946 = vmatmul.mubr.bf16.vlgmr.msra.gmra.mrb[16].mxu1 %v1536_v57  ;;  %2744 = vmatprep.subr.bf16.mxu0 %v3258_v40  ;;  %v2506_v57 = vld [vmem:[%s3699_s5 + $0x7] ss:$0 sm:$0xff] }
 0x6b1   : > { %2144 = vmatpush1.bf16.msra.mxu1 %v2999_v43  ;;  %2175 = vmatprep.mubr.bf16.mxu1 %v3260_v63 }
 0x6b2   : > { %2145 = vmatprep.subr.bf16.mxu1 %v3004_v46 }
 0x6b3   : > { %2745 = vmatpush3.bf16.msra.mxu0 %v2993_v1 }
 0x6b4   : > { %2746 = vmatprep.subr.bf16.mxu0 %v3258_v40 }
 0x6b5   : > { %2146 = vmatpush1.bf16.msra.mxu1 %v3002_v47 }
 0x6b6   : > { %2147 = vmatprep.subr.bf16.mxu1 %v3007_v49 }
 0x6b7   : > { %2747 = vmatpush3.bf16.msra.mxu0 %v2994_v2 }
 0x6b8   : > { %2748 = vmatprep.subr.bf16.mxu0 %v3258_v40 }
 0x6b9   : > { %2148 = vmatpush1.bf16.msra.mxu1 %v3005_v50 }
 0x6ba   : > { %2149 = vmatprep.subr.bf16.mxu1 %v3010_v51 }
 0x6bb   : > { %2749 = vmatpush3.bf16.msra.mxu0 %v2995_v3  ;;  %v2507_v3 = vld [vmem:[%s3699_s5 + $0x8] ss:$0 sm:$0xff] }
 0x6bc   : > { %2750 = vmatprep.subr.bf16.mxu0 %v3258_v40 }
 0x6bd   : > { %2150 = vmatpush1.bf16.msra.mxu1 %v3008_v52 }
 0x6be   : > { %2151 = vmatprep.subr.bf16.mxu1 %v3013_v53 }
 0x6bf   : > { %2751 = vmatpush3.bf16.msra.mxu0 %v2996_v4 }
 0x6c0   : > { %2752 = vmatprep.subr.bf16.mxu0 %v3258_v40 }
 0x6c1   : > { %2152 = vmatpush1.bf16.msra.mxu1 %v3011_v58 }
 0x6c2   : > { %2153 = vmatprep.subr.bf16.mxu1 %v3016_v60 }
 0x6c3   : > { %2753 = vmatpush3.bf16.msra.mxu0 %v2997_v5 }
 0x6c4   : > { %2754 = vmatprep.subr.bf16.mxu0 %v3258_v40 }
 0x6c5   : > { %2154 = vmatpush1.bf16.msra.mxu1 %v3014_v59 }
 0x6c6   : > { %2155 = vmatprep.subr.bf16.mxu1 %v3019_v61 }
 0x6c7   : > { %2755 = vmatpush3.bf16.msra.mxu0 %v2998_v6 }
 0x6c9   : > { %2156 = vmatpush1.bf16.msra.mxu1 %v3017_v62 }
 0x6ca   : > { %2757 = vmatmul.mubr.bf16.vlgmr.msra.gmra.mrb[20].mxu0 %v1547_v7  ;;  %2157 = vmatprep.subr.bf16.mxu1 %v3022_v54 }
 0x6cd   : > { %2158 = vmatpush1.bf16.msra.mxu1 %v3020_v0 }
 0x77d   : > { %v2663_v8 = vpop.f32.mrb[16].mxu0 }
 0x77e   : > { %v2664_v9 = vpop.f32.mrb[17].mxu0 }
 0x77f   : > { %v2665_v10 = vadd.f32 %v2664_v9, %v2663_v8  ;;  %v2666_v11 = vpop.f32.mrb[18].mxu0 }
 0x780   : > { %v2667_v12 = vpop.f32.mrb[19].mxu0 }
 0x781   : > { %v1908_v16 = vadd.f32 %v2665_v10, %v2465_v13 }
 0x783   : > { %v2685_v14 = vpop.f32.mrb[16].mxu1 }
 0x784   : > { %v2686_v15 = vpop.f32.mrb[17].mxu1 }
 0x785   : > { %v2687_v17 = vadd.f32 %v2686_v15, %v2685_v14  ;;  %v2688_v18 = vpop.f32.mrb[18].mxu1 }
 0x786   : > { %v2689_v19 = vpop.f32.mrb[19].mxu1 }
 0x787   : > { %v1948_v20 = vadd.f32 %v2687_v17, %v1908_v16  ;;  %v380_v17 = vld [vmem:[%s3699_s5 + $0xa] sm:$0x1] }
 0x79d   : > { %v1987_v40 = vpop.f32.mrb[20].mxu0 }
 0x79e   : > { %v1988_v21 = vadd.f32 %v1987_v40, %v1948_v20  ;;  %v2758_v22 = vpop.f32.mrb[21].mxu0 }
 0x79f   : > { %v1990_v23 = vpop.f32.mrb[22].mxu0 }
 0x7a0   : > { %v2759_v24 = vpop.f32.mrb[23].mxu0  ;;  %v1993_v25 = vsel %vm1472_vm4, %v1988_v21, 0.0 }
 0x7a1   : > { %1994 = vadd.xlane.f32.xlu0 %v1993_v25  ;;  %v3261_v24 = vmov 1966171168  }
 0x7a2   : > { %v2196_v25 = vunpack.c.l.s4 %v3261_v24 }
 0x82e   : > { %v1995_v26 = vpop.xlane.xlu0 %1994 }
 0x82f   : > { %v1996_v27 = vrot.slane %v1995_v26, 4 }
 0x831   : > { %v1997_v28 = vadd.f32 %v1996_v27, %v1995_v26  ;;  %v2198_v26 = vlaneseq  ;;  %v379_v27 = vld [vmem:[%s3699_s5 + $0x9] sm:$0x1] }
 0x833   : > { %v1998_v29 = vrot.slane %v1997_v28, 2  ;;  %vm2220_vm5 = vcmp.lt.s32.totalorder %v2198_v26, 384 }
 0x835   : > { %v1999_v30 = vadd.f32 %v1998_v29, %v1997_v28  ;;  %v2197_v28 = vunpack.c.0.s8 %v2196_v25  ;;  %v2199_v29 = vshrl.u32 %v2198_v26, 7 }
 0x837   : > { %v2000_v31 = vrot.slane %v1999_v30, 1 }
 0x839   : > { %v2001_v32 = vadd.f32 %v2000_v31, %v1999_v30 }
 0x83b   : > { %2773 = vpush %v2001_v32 }
 0x86c   : > { %s2774_s22 = spop %2773 }
 0x86d   : > { %s2003_s12 = smul.f32 0.0015625, %s2774_s22 }
 0x86f   : > { %v2004_v33 = vstv %s2003_s12  ;;  %s368_s12 = scalar_lea.vmem %s3700_s6, %s367_s16 }
 0x870   : > { %v2005_v34 = vsub.f32 %v1988_v21, %v2004_v33  ;;  %v2188_v31 = vld [vmem:[%s368_s12] sm:$0x1] }
 0x872   : > { %v2006_v35 = vmul.f32 %v2005_v34, %v2005_v34 }
 0x874   : > { %v2007_v36 = vsel %vm1472_vm4, %v2006_v35, 0.0 }
 0x875   : > { %2008 = vadd.xlane.f32.xlu1 %v2007_v36  ;;  %v2200_v36 = vsub.s32 %v2197_v28, %v2199_v29 }
 0x902   : > { %v2009_v37 = vpop.xlane.xlu1 %2008 }
 0x903   : > { %v2010_v38 = vrot.slane %v2009_v37, 4 }
 0x905   : > { %v2011_v39 = vadd.f32 %v2010_v38, %v2009_v37 }
 0x907   : > { %v2012_v41 = vrot.slane %v2011_v39, 2 }
 0x909   : > { %v2013_v44 = vadd.f32 %v2012_v41, %v2011_v39 }
 0x90b   : > { %v2014_v45 = vrot.slane %v2013_v44, 1 }
 0x90d   : > { %v2015_v48 = vadd.f32 %v2014_v45, %v2013_v44 }
 0x90f   : > { %2775 = vpush %v2015_v48 }
 0x940   : > { %s2776_s30 = spop %2775 }
 0x941   : > { %s2017_s9 = smul.f32 0.0015625, %s2776_s30 }
 0x943   : > { %s2018_s13 = sadd.f32 1e-05, %s2017_s9 }
 0x945   : > { %v2019_v55 = vstv %s2018_s13  ;;  %s2760_s13 = smul.u32 3, %s3526_s21 }
 0x946   : > { %3027 = vrsqrt.f32 %v2019_v55 }
 0x947   : > { %s365_s14 = scalar_lea.vmem [#allocation14], %s2760_s13 }
 0x948   : > { %s2238_s8 = sshll.u32 %s365_s14, 4  ;;  %s3652_s8 = int_to_ptr.vmem [resolvable:$true] %s2238_s8 }
 0x949   : > { %s3173_s16 = scalar_lea.vmem %s3652_s8, 48 }
 0x94a   : > { %p3174_p5 = scmp.ne.s32.totalorder %s3652_s8, %s3173_s16 }
 0x94c   : > { %p3175_p7 = pnand %p3174_p5, %p3474_p3 }
 0x94e   : > { %p3176_p12 = pneg %p3175_p7 }
 0x950   : > { %v3028_v56 = vpop.eup %3027 }
 0x951   : > { %2777 = vpush %v3028_v56 }
 0x982   : > { %s2778_s15 = spop %2777 }
 0x983   : > { %v2022_v1 = vstv %s2778_s15  ;;  %s2779_s15 = smul.u32 48, %s3324_s28  ;;  %s3262_s28 = smov [#allocation14]  }
 0x984   : > { %v2023_v2 = vmul.f32 %v2022_v1, %v2005_v34  ;;  %s3177_s11 = sshll.u32 %s3262_s28, 4  ;;  %s3178_s11 = int_to_ptr.vmem [resolvable:$false] %s3177_s11 }
 0x985   : > { %s3650_s10 = scalar_lea.hbm %s3701_s7, %s2779_s15  ;;  %s3179_s22 = scalar_lea.vmem %s3178_s11, 96 }
 0x986   : > { %v2028_v4 = vmul.f32 %v2506_v57, %v2023_v2  ;;  %p3180_p1 = scmp.lt.s32.totalorder %s3652_s8, %s3178_s11  ;;  %p3181_p2 = scmp.lt.s32.totalorder %s3179_s22, %s3173_s16 }
 0x988   : > { %v2033_v5 = vadd.f32 %v2507_v3, %v2028_v4  ;;  %p3182_p13 = por %p3181_p2, %p3180_p1 }
 0x98a   : > { %v2034_v6 = vmax.f32 %v2033_v5, 0.0  ;;  %p3183_p9 = pnand %p3182_p13, %p3176_p12 }
 0x98c   : > { %v2035_v7 = vsel %vm1472_vm4, %v2034_v6, 0.0 }
 0x98d   : > { %v2036_v8 = vrot.slane %v2035_v7, 4 }
 0x98f   : > { %v2037_v9 = vadd.f32 %v2036_v8, %v2035_v7 }
 0x991   : > { %v2038_v10 = vrot.slane %v2037_v9, 2 }
 0x993   : > { %v2039_v11 = vadd.f32 %v2038_v10, %v2037_v9 }
 0x995   : > { %v2040_v12 = vrot.slane %v2039_v11, 1 }
 0x997   : > { %v2041_v13 = vadd.f32 %v2040_v12, %v2039_v11 }
 0x999   : > { %v2043_v14 = vmul.f32 0.2, %v2041_v13 }
 0x99b   : > { %2044 = vst [vmem:[#allocation4] sm:$0x1] %v2043_v14 }
 0x9a2   : > { %v2045_v15 = vld [vmem:[#allocation4] sm:$0x1] }
 0x9a3   : > { %v2046_v16 = vpack.c.bf16 %v2045_v15, %v2045_v15 }
 0x9a5   : > { %2176 = vmatmul.mubr.bf16.vlgmr.msra.gmra.mrb[20].mxu1 %v2046_v16 }
 0xa78   : > { %v2177_v18 = vpop.f32.mrb[20].mxu1 }
 0xa79   : > { %v2179_v19 = vpop.f32.mrb[21].mxu1  ;;  %v2178_v32 = vadd.f32 %v2177_v18, %v379_v27 }
 0xa7a   : > { %v2180_v20 = vadd.f32 %v2179_v19, %v380_v17  ;;  %v2181_v40 = vpop.f32.mrb[22].mxu1 }
 0xa7b   : > { %v2182_v21 = vpop.f32.mrb[23].mxu1 }
 0xa7c   : > { %v2184_v22 = vmul.f32 0.5, %v2180_v20 }
 0xa7e   : > { %v2185_v23 = vmul.f32 1.442695, %v2184_v22 }
 0xa80   : > { %3029 = vpow2.f32 %v2185_v23 }
 0xa8a   : > { %v3030_v30 = vpop.eup %3029 }
 0xa8b   : > { %v2187_v33 = vmax.f32 %v3030_v30, 1e-06 }
 0xa8d   : > { %v2189_v34 = vmul.f32 %v2188_v31, %v2187_v33  ;;  %v2194_v35 = vcombine.low %v2178_v32, %v2187_v33 }
 0xa8f   : > { %v2190_v37 = vadd.f32 %v2189_v34, %v2178_v32  ;;  %v2201_v38 = vrot.slane %v2194_v35, %v2200_v36 }
 0xa91   : > { %v2208_v39 = vrot.slane %v2190_v37, %v2200_v36 }
 0xa93   : > { %v2209_v41 = vcombine.low %v2201_v38, %v2208_v39 }
 0xa95   : > { %v2216_v42 = vrot.slane %v2209_v41, %v2200_v36 }
 0xa97   : > { %2222 = vst.msk [vmem:[%s365_s14] sm:$0x7] %vm2220_vm5, %v2216_v42 }
 0xa98   : > { %3186 = shalt.err (!%p3183_p9)
}
 0xa99   : > { %s3187_s21 = scalar_lea.hbm %s3650_s10, 48  ;;  %s3191_s9 = scalar_lea.hbm %s3701_s7, 96 }
 0xa9a   : > { %p3188_p0 = scmp.ne.s32.totalorder %s3650_s10, %s3187_s21  ;;  %p3192_p8 = scmp.lt.u32.totalorder %s3650_s10, %s3701_s7 }
 0xa9b   : > { %p3193_p6 = scmp.lt.u32.totalorder %s3191_s9, %s3187_s21  ;;  %p3195_p5 = scmp.lt.u32.totalorder %s3187_s21, %s3650_s10 }
 0xa9c   : > { %p3189_p11 = pnand %p3188_p0, %p3474_p3 }
 0xa9d   : > { %p3194_p10 = por %p3193_p6, %p3192_p8 }
 0xa9e   : > { %p3190_p4 = pneg %p3189_p11 }
 0xa9f   : > { %p3196_p7 = por %p3195_p5, %p3194_p10 }
 0xaa1   : > { %p3197_p12 = pnand %p3196_p7, %p3190_p4 }
 0xaa3   : > { %3200 = shalt.err (!%p3197_p12)
}
 0xaa4   : > { %2798 = dma.vmem_to_hbm [thread:$0]  (%p3474_p3), %s3652_s8, 48, %s3650_s10, %s2224_s18  }
 0xaa5 PF: > { %s3721_s14 = sld [smem:[#allocation19_spill]]  ;;  %s2250_s17 = sand.u32 1, %s3235_s24  }
 0xaa6   : > { %p3723_p2 = scmp.ge.s32.totalorder %s3247_s27, 2  ;;  %s2251_s20 = scalar_lea.sflag [#allocation7], %s2250_s17 }
 0xaab   : > { %p3722_p1 = scmp.ne.s32.totalorder %s3721_s14, 0 }
 0xaad   : > { %p2818_p13 = pnand %p3723_p2, %p3722_p1 }
 0xaaf   : > { %3230 = dma.done.wait (!%p2818_p13), %s2251_s20, 48  }
 0xab0   : > { %3232 = vsyncadd (!%p2818_p13), %s2251_s20, 4294967248  ;;  %p22_p9 = scmp.ge.s32.totalorder %s3461_s19, 4   ;;  %s3724_s24 = smov %s3239_s25 }
 0xab1   : > { %s3725_s25 = smov %s3243_s26  ;;  %s3726_s26 = smov %s3470_s23 }
 0xab2   : > { %s3727_s27 = smov %s3461_s19  ;;  %24 = sbr.rel (!%p22_p9) target bundleno = 7 (0x7), region = 117 }
 0xab9   :  { %2256 = vsyncpa [#allocation6], 1 }
 0xaba   :  { %2258 = vsyncpa [#allocation6 + $0x1], 1 }
 0xabb   :  { %2259 = vsyncpa [#allocation9], 1 }
 0xabc   :  { %2260 = vsyncpa [#allocation12], 1 }
 0xabd   :  { %2261 = vsyncpa [#allocation7], 1 }
 0xabe   :  { %2263 = vsyncpa [#allocation7 + $0x1], 1 }

</bundles_post_ra>
